<compile_context>
chip_gen: v6e
topology: v6e:2x2x1
jax: 0.10.0
libtpu: 0.0.40
codegen_flags: <defaults>
</compile_context>

<pallas_src>
import math

import jax
import jax.numpy as jnp
from jax import lax
from jax.experimental import pallas as pl
from jax.experimental.pallas import tpu as pltpu

# ----------------------------- model config (small) -----------------------------
VOCAB       = 64
D_MODEL     = 32
NUM_HEADS   = 4
HEAD_DIM    = 8                       # inner_dim = NUM_HEADS * HEAD_DIM == D_MODEL
INNER       = NUM_HEADS * HEAD_DIM
D_FF        = 64
NUM_BLOCKS  = 3
NUM_LABELS  = 3
NUM_BUCKETS = 32
MAX_DIST    = 128
LN_EPS      = 1e-6
LANE_PAD    = 128                     # lane-padded classifier output width


# ----------------------------- in-kernel helpers ---------------------------------
def _rms(x, w):
    # T5LayerNorm: x * rsqrt(mean(x^2) + eps) * weight  (no mean subtraction, no bias)
    var = jnp.mean(x * x, axis=-1, keepdims=True)
    return x * lax.rsqrt(var + LN_EPS) * w


def _gelu_new(x):
    # HF NewGELUActivation (tanh approximation), used by T5 gated-gelu
    return 0.5 * x * (1.0 + jnp.tanh(math.sqrt(2.0 / math.pi) * (x + 0.044715 * x * x * x)))


# ----------------------------- fused kernel --------------------------------------
def _fused_t5_kernel(x_ref, mask_ref, relb_ref,
                     ln_attn_ref, wqkv_ref, wo_ref,
                     ln_ff_ref, wi_ref, wo_ff_ref,
                     final_ln_ref, dense_w_ref, dense_b_ref,
                     out_w_ref, out_b_ref,
                     o_ref):
    S = x_ref.shape[1]
    x = x_ref[0].astype(jnp.float32)                 # (S, D) — one batch per program
    mask_row = mask_ref[0].astype(jnp.float32)       # (1, S) raw 0/1 mask, ADDED to scores

    for i in range(NUM_BLOCKS):
        # ---- self-attention sublayer (pre-RMSNorm, residual) ----
        n = _rms(x, ln_attn_ref[i])                                          # (S, D)
        qkv = jnp.dot(n, wqkv_ref[i], preferred_element_type=jnp.float32)    # (S, 3*INNER)
        q = qkv[:, 0 * INNER:1 * INNER]
        k = qkv[:, 1 * INNER:2 * INNER]
        v = qkv[:, 2 * INNER:3 * INNER]
        wo_blk = wo_ref[i]                                                   # (INNER, D)

        attn_out = jnp.zeros((S, D_MODEL), jnp.float32)
        for h in range(NUM_HEADS):
            lo, hi = h * HEAD_DIM, (h + 1) * HEAD_DIM
            qh, kh, vh = q[:, lo:hi], k[:, lo:hi], v[:, lo:hi]
            # T5: NO 1/sqrt(d) scaling; contract on last axis (no explicit k.T)
            s = lax.dot_general(qh, kh, (((1,), (1,)), ((), ())),
                                preferred_element_type=jnp.float32)          # (S, S)
            if i == 0:
                s = s + relb_ref[h]                 # relative bias only in block 0
            s = s + mask_row                        # raw 0/1 mask added (reference)
            s = s - jnp.max(s, axis=-1, keepdims=True)
            p = jnp.exp(s)
            p = p * pl.reciprocal(jnp.sum(p, axis=-1, keepdims=True), approx=True)
            oh = jnp.dot(p, vh, preferred_element_type=jnp.float32)          # (S, Dh)
            # concat over heads folded into the output projection:
            attn_out = attn_out + jnp.dot(oh, wo_blk[lo:hi, :],
                                          preferred_element_type=jnp.float32)
        x = x + attn_out

        # ---- feed-forward sublayer (gated-gelu, pre-RMSNorm, residual) ----
        n = _rms(x, ln_ff_ref[i])
        hidden = jnp.dot(n, wi_ref[i], preferred_element_type=jnp.float32)   # (S, 2*D_FF)
        hg = _gelu_new(hidden[:, :D_FF])
        hl = hidden[:, D_FF:]
        x = x + jnp.dot(hg * hl, wo_ff_ref[i], preferred_element_type=jnp.float32)

    # ---- final norm applied TWICE (self.dropout aliases final_layer_norm) ----
    # The classifier only consumes token 0, so the double RMS-norm is applied to
    # the first row only (RMS norm is strictly per-row, so this is exact).
    w_final = final_ln_ref[...]
    cls = _rms(_rms(x[0:1, :], w_final), w_final)                            # (1, D)

    # ---- classifier head on token 0 (lane-padded logits, unmasked store) ----
    y = jnp.tanh(jnp.dot(cls, dense_w_ref[...], preferred_element_type=jnp.float32)
                 + dense_b_ref[...])
    logits = (jnp.dot(y, out_w_ref[...], preferred_element_type=jnp.float32)
              + out_b_ref[...])                                              # (1, LANE_PAD)
    o_ref[0] = logits.astype(o_ref.dtype)


# ----------------------------- T5 relative position bias (glue) ------------------
def _relative_position_bucket(rel_pos, num_buckets=NUM_BUCKETS, max_distance=MAX_DIST):
    # bidirectional (encoder) bucketing, as in HF T5Attention._relative_position_bucket
    num_buckets = num_buckets // 2
    buckets = (rel_pos > 0).astype(jnp.int32) * num_buckets
    rel_pos = jnp.abs(rel_pos)
    max_exact = num_buckets // 2
    is_small = rel_pos < max_exact
    rel_if_large = max_exact + (
        jnp.log(jnp.maximum(rel_pos, 1).astype(jnp.float32) / max_exact)
        / math.log(max_distance / max_exact)
        * (num_buckets - max_exact)
    ).astype(jnp.int32)
    rel_if_large = jnp.minimum(rel_if_large, num_buckets - 1)
    return buckets + jnp.where(is_small, rel_pos, rel_if_large)


def compute_rel_bias(rel_emb, seq_len):
    ctx = jnp.arange(seq_len)[:, None]
    mem = jnp.arange(seq_len)[None, :]
    buckets = _relative_position_bucket(mem - ctx)            # (S, S)
    values = rel_emb[buckets]                                  # (S, S, H) gather (glue)
    return jnp.transpose(values, (2, 0, 1)).astype(jnp.float32)  # (H, S, S)


# ----------------------------- model forward -------------------------------------
@jax.jit
def model_forward(params, input_ids, attention_mask):
    B, S = input_ids.shape
    x = params["embed"][input_ids]                             # (B, S, D) gather (glue)
    mask = attention_mask[:, None, :].astype(jnp.float32)      # (B, 1, S) raw 0/1 mask
    rel_bias = compute_rel_bias(params["rel_emb"], S)          # (H, S, S)

    # lane-pad the classifier output projection so the kernel does an unmasked store
    out_w_pad = jnp.zeros((D_MODEL, LANE_PAD), jnp.float32).at[:, :NUM_LABELS].set(
        params["cls_out_w"])
    out_b_pad = jnp.zeros((1, LANE_PAD), jnp.float32).at[0, :NUM_LABELS].set(
        params["cls_out_b"])

    const3 = lambda b: (0, 0, 0)
    const2 = lambda b: (0, 0)

    out = pl.pallas_call(
        _fused_t5_kernel,
        out_shape=jax.ShapeDtypeStruct((B, 1, LANE_PAD), jnp.float32),
        grid=(B,),
        in_specs=[
            pl.BlockSpec((1, S, D_MODEL), lambda b: (b, 0, 0)),            # x
            pl.BlockSpec((1, 1, S), lambda b: (b, 0, 0)),                  # mask
            pl.BlockSpec((NUM_HEADS, S, S), const3),                       # rel bias
            pl.BlockSpec((NUM_BLOCKS, 1, D_MODEL), const3),                # ln_attn
            pl.BlockSpec((NUM_BLOCKS, D_MODEL, 3 * INNER), const3),        # wqkv
            pl.BlockSpec((NUM_BLOCKS, INNER, D_MODEL), const3),            # wo
            pl.BlockSpec((NUM_BLOCKS, 1, D_MODEL), const3),                # ln_ff
            pl.BlockSpec((NUM_BLOCKS, D_MODEL, 2 * D_FF), const3),         # wi (wi0|wi1)
            pl.BlockSpec((NUM_BLOCKS, D_FF, D_MODEL), const3),             # wo_ff
            pl.BlockSpec((1, D_MODEL), const2),                            # final_ln
            pl.BlockSpec((D_MODEL, D_MODEL), const2),                      # cls dense w
            pl.BlockSpec((1, D_MODEL), const2),                            # cls dense b
            pl.BlockSpec((D_MODEL, LANE_PAD), const2),                     # cls out w (pad)
            pl.BlockSpec((1, LANE_PAD), const2),                           # cls out b (pad)
        ],
        out_specs=pl.BlockSpec((1, 1, LANE_PAD), lambda b: (b, 0, 0)),
        compiler_params=pltpu.CompilerParams(
            dimension_semantics=("parallel",)),                # 2-TC use on v7x
    )(x, mask, rel_bias,
      params["ln_attn"], params["wqkv"], params["wo"],
      params["ln_ff"], params["wi"], params["wo_ff"],
      params["final_ln"][None, :], params["cls_dense_w"],
      params["cls_dense_b"][None, :], out_w_pad, out_b_pad)

    return out[:, 0, :NUM_LABELS]                              # (B, NUM_LABELS)


# ----------------------------- deterministic params ------------------------------
def init_params(key):
    def nrm(k, shape, scale=0.02):
        return (scale * jax.random.normal(k, shape)).astype(jnp.float32)

    keys = jax.random.split(key, 8 + NUM_BLOCKS)
    blocks = []
    for i in range(NUM_BLOCKS):
        bk = jax.random.split(keys[8 + i], 8)
        blocks.append({
            "ln_attn": jnp.ones((D_MODEL,), jnp.float32),
            "wq": nrm(bk[0], (D_MODEL, INNER)),
            "wk": nrm(bk[1], (D_MODEL, INNER)),
            "wv": nrm(bk[2], (D_MODEL, INNER)),
            "wo": nrm(bk[3], (INNER, D_MODEL)),
            "ln_ff": jnp.ones((D_MODEL,), jnp.float32),
            "wi0": nrm(bk[4], (D_MODEL, D_FF)),
            "wi1": nrm(bk[5], (D_MODEL, D_FF)),
            "wo_ff": nrm(bk[6], (D_FF, D_MODEL)),
        })

    params = {
        "embed": nrm(keys[0], (VOCAB, D_MODEL), 1.0),
        "rel_emb": nrm(keys[1], (NUM_BUCKETS, NUM_HEADS)),
        "final_ln": jnp.ones((D_MODEL,), jnp.float32),
        "cls_dense_w": nrm(keys[2], (D_MODEL, D_MODEL)),
        "cls_dense_b": jnp.zeros((D_MODEL,), jnp.float32),
        "cls_out_w": nrm(keys[3], (D_MODEL, NUM_LABELS)),
        "cls_out_b": jnp.zeros((NUM_LABELS,), jnp.float32),
        # packed / stacked weights consumed by the fused kernel:
        "ln_attn": jnp.stack([b["ln_attn"][None, :] for b in blocks]),          # (NB,1,D)
        "wqkv": jnp.stack([jnp.concatenate([b["wq"], b["wk"], b["wv"]], axis=1)
                           for b in blocks]),                                   # (NB,D,3*INNER)
        "wo": jnp.stack([b["wo"] for b in blocks]),                             # (NB,INNER,D)
        "ln_ff": jnp.stack([b["ln_ff"][None, :] for b in blocks]),              # (NB,1,D)
        "wi": jnp.stack([jnp.concatenate([b["wi0"], b["wi1"]], axis=1)
                         for b in blocks]),                                     # (NB,D,2*D_FF)
        "wo_ff": jnp.stack([b["wo_ff"] for b in blocks]),                       # (NB,D_FF,D)
    }
    return params


# ----------------------------- main ----------------------------------------------
if __name__ == "__main__":
    key = jax.random.PRNGKey(0)
    kp, kid = jax.random.split(key)

    B, S = 2, 8
    params = init_params(kp)
    input_ids = jax.random.randint(kid, (B, S), 0, VOCAB, dtype=jnp.int32)
    # simple padding mask: batch 0 fully valid, batch 1 has last 3 tokens padded
    lengths = jnp.array([S, S - 3], dtype=jnp.int32)
    attention_mask = (jnp.arange(S)[None, :] < lengths[:, None]).astype(jnp.float32)

    logits = model_forward(params, input_ids, attention_mask)
    jax.block_until_ready(logits)
    assert logits.shape == (B, NUM_LABELS)
    print("KERNEL_OK")
</pallas_src>

<mosaic_0001>
module attributes {stable_mosaic.version = 11 : i64} {
  func.func @_fused_t5_kernel(%arg0: i32, %arg1: memref<1x8x32xf32, #tpu.memory_space<vmem>>, %arg2: memref<1x1x8xf32, #tpu.memory_space<vmem>>, %arg3: memref<4x8x8xf32, #tpu.memory_space<vmem>>, %arg4: memref<3x1x32xf32, #tpu.memory_space<vmem>>, %arg5: memref<3x32x96xf32, #tpu.memory_space<vmem>>, %arg6: memref<3x32x32xf32, #tpu.memory_space<vmem>>, %arg7: memref<3x1x32xf32, #tpu.memory_space<vmem>>, %arg8: memref<3x32x128xf32, #tpu.memory_space<vmem>>, %arg9: memref<3x64x32xf32, #tpu.memory_space<vmem>>, %arg10: memref<1x32xf32, #tpu.memory_space<vmem>>, %arg11: memref<32x32xf32, #tpu.memory_space<vmem>>, %arg12: memref<1x32xf32, #tpu.memory_space<vmem>>, %arg13: memref<32x128xf32, #tpu.memory_space<vmem>>, %arg14: memref<1x128xf32, #tpu.memory_space<vmem>>, %arg15: memref<1x1x128xf32, #tpu.memory_space<vmem>>) attributes {dimension_semantics = [#tpu.dimension_semantics<parallel>], iteration_bounds = array<i64: 2>, scalar_prefetch = 0 : i64, scratch_operands = 0 : i64, tpu.core_type = #tpu.core_type<tc>, window_params = [{transform_indices = @transform_0, window_bounds = array<i64: 1, 8, 32>}, {transform_indices = @transform_1, window_bounds = array<i64: 1, 1, 8>}, {pipeline_mode = #tpu.pipeline_mode<synchronous>, transform_indices = @transform_2, window_bounds = array<i64: 4, 8, 8>}, {pipeline_mode = #tpu.pipeline_mode<synchronous>, transform_indices = @transform_3, window_bounds = array<i64: 3, 1, 32>}, {pipeline_mode = #tpu.pipeline_mode<synchronous>, transform_indices = @transform_4, window_bounds = array<i64: 3, 32, 96>}, {pipeline_mode = #tpu.pipeline_mode<synchronous>, transform_indices = @transform_5, window_bounds = array<i64: 3, 32, 32>}, {pipeline_mode = #tpu.pipeline_mode<synchronous>, transform_indices = @transform_6, window_bounds = array<i64: 3, 1, 32>}, {pipeline_mode = #tpu.pipeline_mode<synchronous>, transform_indices = @transform_7, window_bounds = array<i64: 3, 32, 128>}, {pipeline_mode = #tpu.pipeline_mode<synchronous>, transform_indices = @transform_8, window_bounds = array<i64: 3, 64, 32>}, {pipeline_mode = #tpu.pipeline_mode<synchronous>, transform_indices = @transform_9, window_bounds = array<i64: 1, 32>}, {pipeline_mode = #tpu.pipeline_mode<synchronous>, transform_indices = @transform_10, window_bounds = array<i64: 32, 32>}, {pipeline_mode = #tpu.pipeline_mode<synchronous>, transform_indices = @transform_11, window_bounds = array<i64: 1, 32>}, {pipeline_mode = #tpu.pipeline_mode<synchronous>, transform_indices = @transform_12, window_bounds = array<i64: 32, 128>}, {pipeline_mode = #tpu.pipeline_mode<synchronous>, transform_indices = @transform_13, window_bounds = array<i64: 1, 128>}, {transform_indices = @transform_14, window_bounds = array<i64: 1, 1, 128>}]} {
    %c0 = arith.constant 0 : index
    %c0_0 = arith.constant 0 : index
    %c0_1 = arith.constant 0 : index
    %0 = vector.load %arg1[%c0, %c0_0, %c0_1] : memref<1x8x32xf32, #tpu.memory_space<vmem>>, vector<1x8x32xf32>
    %1 = vector.shape_cast %0 : vector<1x8x32xf32> to vector<8x32xf32>
    %c0_2 = arith.constant 0 : index
    %c0_3 = arith.constant 0 : index
    %c0_4 = arith.constant 0 : index
    %2 = vector.load %arg2[%c0_2, %c0_3, %c0_4] : memref<1x1x8xf32, #tpu.memory_space<vmem>>, vector<1x1x8xf32>
    %3 = vector.shape_cast %2 : vector<1x1x8xf32> to vector<1x8xf32>
    %c0_5 = arith.constant 0 : index
    %c0_6 = arith.constant 0 : index
    %c0_7 = arith.constant 0 : index
    %4 = vector.load %arg4[%c0_5, %c0_6, %c0_7] : memref<3x1x32xf32, #tpu.memory_space<vmem>>, vector<1x1x32xf32>
    %5 = vector.shape_cast %4 : vector<1x1x32xf32> to vector<1x32xf32>
    %6 = arith.mulf %1, %1 : vector<8x32xf32>
    %cst = arith.constant dense<0.000000e+00> : vector<8xf32>
    %7 = vector.multi_reduction <add>, %6, %cst [1] : vector<8x32xf32> to vector<8xf32>
    %8 = vector.shape_cast %7 : vector<8xf32> to vector<8x1xf32>
    %cst_8 = arith.constant 3.200000e+01 : f32
    %9 = vector.broadcast %cst_8 : f32 to vector<8x1xf32>
    %10 = arith.divf %8, %9 : vector<8x1xf32>
    %cst_9 = arith.constant 9.99999997E-7 : f32
    %11 = vector.broadcast %cst_9 : f32 to vector<8x1xf32>
    %12 = arith.addf %10, %11 : vector<8x1xf32>
    %13 = math.rsqrt %12 : vector<8x1xf32>
    %14 = vector.broadcast %13 : vector<8x1xf32> to vector<8x32xf32>
    %15 = arith.mulf %1, %14 : vector<8x32xf32>
    %16 = vector.broadcast %5 : vector<1x32xf32> to vector<8x32xf32>
    %17 = arith.mulf %15, %16 : vector<8x32xf32>
    %c0_10 = arith.constant 0 : index
    %c0_11 = arith.constant 0 : index
    %c0_12 = arith.constant 0 : index
    %18 = vector.load %arg5[%c0_10, %c0_11, %c0_12] : memref<3x32x96xf32, #tpu.memory_space<vmem>>, vector<1x32x96xf32>
    %19 = vector.shape_cast %18 : vector<1x32x96xf32> to vector<32x96xf32>
    %cst_13 = arith.constant dense<0.000000e+00> : vector<8x96xf32>
    %20 = tpu.matmul %17, %19, %cst_13 {dimension_numbers = #tpu.dot_dimension_numbers<[1], [0], [0], [1], [0, 0, 1, 1], [], []>} : vector<8x32xf32>, vector<32x96xf32>, vector<8x96xf32> -> vector<8x96xf32>
    %21 = vector.extract_strided_slice %20 {offsets = [0, 0], sizes = [8, 32], strides = [1, 1]} : vector<8x96xf32> to vector<8x32xf32>
    %22 = vector.extract_strided_slice %20 {offsets = [0, 32], sizes = [8, 32], strides = [1, 1]} : vector<8x96xf32> to vector<8x32xf32>
    %23 = vector.extract_strided_slice %20 {offsets = [0, 64], sizes = [8, 32], strides = [1, 1]} : vector<8x96xf32> to vector<8x32xf32>
    %c0_14 = arith.constant 0 : index
    %c0_15 = arith.constant 0 : index
    %c0_16 = arith.constant 0 : index
    %24 = vector.load %arg6[%c0_14, %c0_15, %c0_16] : memref<3x32x32xf32, #tpu.memory_space<vmem>>, vector<1x32x32xf32>
    %25 = vector.shape_cast %24 : vector<1x32x32xf32> to vector<32x32xf32>
    %cst_17 = arith.constant 0.000000e+00 : f32
    %26 = vector.broadcast %cst_17 : f32 to vector<8x32xf32>
    %27 = vector.extract_strided_slice %21 {offsets = [0, 0], sizes = [8, 8], strides = [1, 1]} : vector<8x32xf32> to vector<8x8xf32>
    %28 = vector.extract_strided_slice %22 {offsets = [0, 0], sizes = [8, 8], strides = [1, 1]} : vector<8x32xf32> to vector<8x8xf32>
    %29 = vector.extract_strided_slice %23 {offsets = [0, 0], sizes = [8, 8], strides = [1, 1]} : vector<8x32xf32> to vector<8x8xf32>
    %cst_18 = arith.constant dense<0.000000e+00> : vector<8x8xf32>
    %30 = tpu.matmul %27, %28, %cst_18 {dimension_numbers = #tpu.dot_dimension_numbers<[1], [1], [0], [0], [0, 0, 1, 0], [], []>} : vector<8x8xf32>, vector<8x8xf32>, vector<8x8xf32> -> vector<8x8xf32>
    %c0_19 = arith.constant 0 : index
    %c0_20 = arith.constant 0 : index
    %c0_21 = arith.constant 0 : index
    %31 = vector.load %arg3[%c0_19, %c0_20, %c0_21] : memref<4x8x8xf32, #tpu.memory_space<vmem>>, vector<1x8x8xf32>
    %32 = vector.shape_cast %31 : vector<1x8x8xf32> to vector<8x8xf32>
    %33 = arith.addf %30, %32 : vector<8x8xf32>
    %34 = vector.broadcast %3 : vector<1x8xf32> to vector<8x8xf32>
    %35 = arith.addf %33, %34 : vector<8x8xf32>
    %cst_22 = arith.constant dense<0xFF800000> : vector<8xf32>
    %36 = vector.multi_reduction <maximumf>, %35, %cst_22 [1] : vector<8x8xf32> to vector<8xf32>
    %37 = vector.shape_cast %36 : vector<8xf32> to vector<8x1xf32>
    %38 = vector.broadcast %37 : vector<8x1xf32> to vector<8x8xf32>
    %39 = arith.subf %35, %38 : vector<8x8xf32>
    %40 = math.exp %39 : vector<8x8xf32>
    %cst_23 = arith.constant dense<0.000000e+00> : vector<8xf32>
    %41 = vector.multi_reduction <add>, %40, %cst_23 [1] : vector<8x8xf32> to vector<8xf32>
    %42 = vector.shape_cast %41 : vector<8xf32> to vector<8x1xf32>
    %43 = tpu.reciprocal %42 {approx = true} : vector<8x1xf32> -> vector<8x1xf32>
    %44 = vector.broadcast %43 : vector<8x1xf32> to vector<8x8xf32>
    %45 = arith.mulf %40, %44 : vector<8x8xf32>
    %cst_24 = arith.constant dense<0.000000e+00> : vector<8x8xf32>
    %46 = tpu.matmul %45, %29, %cst_24 {dimension_numbers = #tpu.dot_dimension_numbers<[1], [0], [0], [1], [0, 0, 1, 1], [], []>} : vector<8x8xf32>, vector<8x8xf32>, vector<8x8xf32> -> vector<8x8xf32>
    %47 = vector.extract_strided_slice %25 {offsets = [0, 0], sizes = [8, 32], strides = [1, 1]} : vector<32x32xf32> to vector<8x32xf32>
    %cst_25 = arith.constant dense<0.000000e+00> : vector<8x32xf32>
    %48 = tpu.matmul %46, %47, %cst_25 {dimension_numbers = #tpu.dot_dimension_numbers<[1], [0], [0], [1], [0, 0, 1, 1], [], []>} : vector<8x8xf32>, vector<8x32xf32>, vector<8x32xf32> -> vector<8x32xf32>
    %49 = arith.addf %26, %48 : vector<8x32xf32>
    %50 = vector.extract_strided_slice %21 {offsets = [0, 8], sizes = [8, 8], strides = [1, 1]} : vector<8x32xf32> to vector<8x8xf32>
    %51 = vector.extract_strided_slice %22 {offsets = [0, 8], sizes = [8, 8], strides = [1, 1]} : vector<8x32xf32> to vector<8x8xf32>
    %52 = vector.extract_strided_slice %23 {offsets = [0, 8], sizes = [8, 8], strides = [1, 1]} : vector<8x32xf32> to vector<8x8xf32>
    %cst_26 = arith.constant dense<0.000000e+00> : vector<8x8xf32>
    %53 = tpu.matmul %50, %51, %cst_26 {dimension_numbers = #tpu.dot_dimension_numbers<[1], [1], [0], [0], [0, 0, 1, 0], [], []>} : vector<8x8xf32>, vector<8x8xf32>, vector<8x8xf32> -> vector<8x8xf32>
    %c1 = arith.constant 1 : index
    %c0_27 = arith.constant 0 : index
    %c0_28 = arith.constant 0 : index
    %54 = vector.load %arg3[%c1, %c0_27, %c0_28] : memref<4x8x8xf32, #tpu.memory_space<vmem>>, vector<1x8x8xf32>
    %55 = vector.shape_cast %54 : vector<1x8x8xf32> to vector<8x8xf32>
    %56 = arith.addf %53, %55 : vector<8x8xf32>
    %57 = vector.broadcast %3 : vector<1x8xf32> to vector<8x8xf32>
    %58 = arith.addf %56, %57 : vector<8x8xf32>
    %cst_29 = arith.constant dense<0xFF800000> : vector<8xf32>
    %59 = vector.multi_reduction <maximumf>, %58, %cst_29 [1] : vector<8x8xf32> to vector<8xf32>
    %60 = vector.shape_cast %59 : vector<8xf32> to vector<8x1xf32>
    %61 = vector.broadcast %60 : vector<8x1xf32> to vector<8x8xf32>
    %62 = arith.subf %58, %61 : vector<8x8xf32>
    %63 = math.exp %62 : vector<8x8xf32>
    %cst_30 = arith.constant dense<0.000000e+00> : vector<8xf32>
    %64 = vector.multi_reduction <add>, %63, %cst_30 [1] : vector<8x8xf32> to vector<8xf32>
    %65 = vector.shape_cast %64 : vector<8xf32> to vector<8x1xf32>
    %66 = tpu.reciprocal %65 {approx = true} : vector<8x1xf32> -> vector<8x1xf32>
    %67 = vector.broadcast %66 : vector<8x1xf32> to vector<8x8xf32>
    %68 = arith.mulf %63, %67 : vector<8x8xf32>
    %cst_31 = arith.constant dense<0.000000e+00> : vector<8x8xf32>
    %69 = tpu.matmul %68, %52, %cst_31 {dimension_numbers = #tpu.dot_dimension_numbers<[1], [0], [0], [1], [0, 0, 1, 1], [], []>} : vector<8x8xf32>, vector<8x8xf32>, vector<8x8xf32> -> vector<8x8xf32>
    %70 = vector.extract_strided_slice %25 {offsets = [8, 0], sizes = [8, 32], strides = [1, 1]} : vector<32x32xf32> to vector<8x32xf32>
    %cst_32 = arith.constant dense<0.000000e+00> : vector<8x32xf32>
    %71 = tpu.matmul %69, %70, %cst_32 {dimension_numbers = #tpu.dot_dimension_numbers<[1], [0], [0], [1], [0, 0, 1, 1], [], []>} : vector<8x8xf32>, vector<8x32xf32>, vector<8x32xf32> -> vector<8x32xf32>
    %72 = arith.addf %49, %71 : vector<8x32xf32>
    %73 = vector.extract_strided_slice %21 {offsets = [0, 16], sizes = [8, 8], strides = [1, 1]} : vector<8x32xf32> to vector<8x8xf32>
    %74 = vector.extract_strided_slice %22 {offsets = [0, 16], sizes = [8, 8], strides = [1, 1]} : vector<8x32xf32> to vector<8x8xf32>
    %75 = vector.extract_strided_slice %23 {offsets = [0, 16], sizes = [8, 8], strides = [1, 1]} : vector<8x32xf32> to vector<8x8xf32>
    %cst_33 = arith.constant dense<0.000000e+00> : vector<8x8xf32>
    %76 = tpu.matmul %73, %74, %cst_33 {dimension_numbers = #tpu.dot_dimension_numbers<[1], [1], [0], [0], [0, 0, 1, 0], [], []>} : vector<8x8xf32>, vector<8x8xf32>, vector<8x8xf32> -> vector<8x8xf32>
    %c2 = arith.constant 2 : index
    %c0_34 = arith.constant 0 : index
    %c0_35 = arith.constant 0 : index
    %77 = vector.load %arg3[%c2, %c0_34, %c0_35] : memref<4x8x8xf32, #tpu.memory_space<vmem>>, vector<1x8x8xf32>
    %78 = vector.shape_cast %77 : vector<1x8x8xf32> to vector<8x8xf32>
    %79 = arith.addf %76, %78 : vector<8x8xf32>
    %80 = vector.broadcast %3 : vector<1x8xf32> to vector<8x8xf32>
    %81 = arith.addf %79, %80 : vector<8x8xf32>
    %cst_36 = arith.constant dense<0xFF800000> : vector<8xf32>
    %82 = vector.multi_reduction <maximumf>, %81, %cst_36 [1] : vector<8x8xf32> to vector<8xf32>
    %83 = vector.shape_cast %82 : vector<8xf32> to vector<8x1xf32>
    %84 = vector.broadcast %83 : vector<8x1xf32> to vector<8x8xf32>
    %85 = arith.subf %81, %84 : vector<8x8xf32>
    %86 = math.exp %85 : vector<8x8xf32>
    %cst_37 = arith.constant dense<0.000000e+00> : vector<8xf32>
    %87 = vector.multi_reduction <add>, %86, %cst_37 [1] : vector<8x8xf32> to vector<8xf32>
    %88 = vector.shape_cast %87 : vector<8xf32> to vector<8x1xf32>
    %89 = tpu.reciprocal %88 {approx = true} : vector<8x1xf32> -> vector<8x1xf32>
    %90 = vector.broadcast %89 : vector<8x1xf32> to vector<8x8xf32>
    %91 = arith.mulf %86, %90 : vector<8x8xf32>
    %cst_38 = arith.constant dense<0.000000e+00> : vector<8x8xf32>
    %92 = tpu.matmul %91, %75, %cst_38 {dimension_numbers = #tpu.dot_dimension_numbers<[1], [0], [0], [1], [0, 0, 1, 1], [], []>} : vector<8x8xf32>, vector<8x8xf32>, vector<8x8xf32> -> vector<8x8xf32>
    %93 = vector.extract_strided_slice %25 {offsets = [16, 0], sizes = [8, 32], strides = [1, 1]} : vector<32x32xf32> to vector<8x32xf32>
    %cst_39 = arith.constant dense<0.000000e+00> : vector<8x32xf32>
    %94 = tpu.matmul %92, %93, %cst_39 {dimension_numbers = #tpu.dot_dimension_numbers<[1], [0], [0], [1], [0, 0, 1, 1], [], []>} : vector<8x8xf32>, vector<8x32xf32>, vector<8x32xf32> -> vector<8x32xf32>
    %95 = arith.addf %72, %94 : vector<8x32xf32>
    %96 = vector.extract_strided_slice %21 {offsets = [0, 24], sizes = [8, 8], strides = [1, 1]} : vector<8x32xf32> to vector<8x8xf32>
    %97 = vector.extract_strided_slice %22 {offsets = [0, 24], sizes = [8, 8], strides = [1, 1]} : vector<8x32xf32> to vector<8x8xf32>
    %98 = vector.extract_strided_slice %23 {offsets = [0, 24], sizes = [8, 8], strides = [1, 1]} : vector<8x32xf32> to vector<8x8xf32>
    %cst_40 = arith.constant dense<0.000000e+00> : vector<8x8xf32>
    %99 = tpu.matmul %96, %97, %cst_40 {dimension_numbers = #tpu.dot_dimension_numbers<[1], [1], [0], [0], [0, 0, 1, 0], [], []>} : vector<8x8xf32>, vector<8x8xf32>, vector<8x8xf32> -> vector<8x8xf32>
    %c3 = arith.constant 3 : index
    %c0_41 = arith.constant 0 : index
    %c0_42 = arith.constant 0 : index
    %100 = vector.load %arg3[%c3, %c0_41, %c0_42] : memref<4x8x8xf32, #tpu.memory_space<vmem>>, vector<1x8x8xf32>
    %101 = vector.shape_cast %100 : vector<1x8x8xf32> to vector<8x8xf32>
    %102 = arith.addf %99, %101 : vector<8x8xf32>
    %103 = vector.broadcast %3 : vector<1x8xf32> to vector<8x8xf32>
    %104 = arith.addf %102, %103 : vector<8x8xf32>
    %cst_43 = arith.constant dense<0xFF800000> : vector<8xf32>
    %105 = vector.multi_reduction <maximumf>, %104, %cst_43 [1] : vector<8x8xf32> to vector<8xf32>
    %106 = vector.shape_cast %105 : vector<8xf32> to vector<8x1xf32>
    %107 = vector.broadcast %106 : vector<8x1xf32> to vector<8x8xf32>
    %108 = arith.subf %104, %107 : vector<8x8xf32>
    %109 = math.exp %108 : vector<8x8xf32>
    %cst_44 = arith.constant dense<0.000000e+00> : vector<8xf32>
    %110 = vector.multi_reduction <add>, %109, %cst_44 [1] : vector<8x8xf32> to vector<8xf32>
    %111 = vector.shape_cast %110 : vector<8xf32> to vector<8x1xf32>
    %112 = tpu.reciprocal %111 {approx = true} : vector<8x1xf32> -> vector<8x1xf32>
    %113 = vector.broadcast %112 : vector<8x1xf32> to vector<8x8xf32>
    %114 = arith.mulf %109, %113 : vector<8x8xf32>
    %cst_45 = arith.constant dense<0.000000e+00> : vector<8x8xf32>
    %115 = tpu.matmul %114, %98, %cst_45 {dimension_numbers = #tpu.dot_dimension_numbers<[1], [0], [0], [1], [0, 0, 1, 1], [], []>} : vector<8x8xf32>, vector<8x8xf32>, vector<8x8xf32> -> vector<8x8xf32>
    %116 = vector.extract_strided_slice %25 {offsets = [24, 0], sizes = [8, 32], strides = [1, 1]} : vector<32x32xf32> to vector<8x32xf32>
    %cst_46 = arith.constant dense<0.000000e+00> : vector<8x32xf32>
    %117 = tpu.matmul %115, %116, %cst_46 {dimension_numbers = #tpu.dot_dimension_numbers<[1], [0], [0], [1], [0, 0, 1, 1], [], []>} : vector<8x8xf32>, vector<8x32xf32>, vector<8x32xf32> -> vector<8x32xf32>
    %118 = arith.addf %95, %117 : vector<8x32xf32>
    %119 = arith.addf %1, %118 : vector<8x32xf32>
    %c0_47 = arith.constant 0 : index
    %c0_48 = arith.constant 0 : index
    %c0_49 = arith.constant 0 : index
    %120 = vector.load %arg7[%c0_47, %c0_48, %c0_49] : memref<3x1x32xf32, #tpu.memory_space<vmem>>, vector<1x1x32xf32>
    %121 = vector.shape_cast %120 : vector<1x1x32xf32> to vector<1x32xf32>
    %122 = arith.mulf %119, %119 : vector<8x32xf32>
    %cst_50 = arith.constant dense<0.000000e+00> : vector<8xf32>
    %123 = vector.multi_reduction <add>, %122, %cst_50 [1] : vector<8x32xf32> to vector<8xf32>
    %124 = vector.shape_cast %123 : vector<8xf32> to vector<8x1xf32>
    %cst_51 = arith.constant 3.200000e+01 : f32
    %125 = vector.broadcast %cst_51 : f32 to vector<8x1xf32>
    %126 = arith.divf %124, %125 : vector<8x1xf32>
    %cst_52 = arith.constant 9.99999997E-7 : f32
    %127 = vector.broadcast %cst_52 : f32 to vector<8x1xf32>
    %128 = arith.addf %126, %127 : vector<8x1xf32>
    %129 = math.rsqrt %128 : vector<8x1xf32>
    %130 = vector.broadcast %129 : vector<8x1xf32> to vector<8x32xf32>
    %131 = arith.mulf %119, %130 : vector<8x32xf32>
    %132 = vector.broadcast %121 : vector<1x32xf32> to vector<8x32xf32>
    %133 = arith.mulf %131, %132 : vector<8x32xf32>
    %c0_53 = arith.constant 0 : index
    %c0_54 = arith.constant 0 : index
    %c0_55 = arith.constant 0 : index
    %134 = vector.load %arg8[%c0_53, %c0_54, %c0_55] : memref<3x32x128xf32, #tpu.memory_space<vmem>>, vector<1x32x128xf32>
    %135 = vector.shape_cast %134 : vector<1x32x128xf32> to vector<32x128xf32>
    %cst_56 = arith.constant dense<0.000000e+00> : vector<8x128xf32>
    %136 = tpu.matmul %133, %135, %cst_56 {dimension_numbers = #tpu.dot_dimension_numbers<[1], [0], [0], [1], [0, 0, 1, 1], [], []>} : vector<8x32xf32>, vector<32x128xf32>, vector<8x128xf32> -> vector<8x128xf32>
    %137 = vector.extract_strided_slice %136 {offsets = [0, 0], sizes = [8, 64], strides = [1, 1]} : vector<8x128xf32> to vector<8x64xf32>
    %cst_57 = arith.constant 5.000000e-01 : f32
    %138 = vector.broadcast %cst_57 : f32 to vector<8x64xf32>
    %139 = arith.mulf %138, %137 : vector<8x64xf32>
    %cst_58 = arith.constant 4.471500e-02 : f32
    %140 = vector.broadcast %cst_58 : f32 to vector<8x64xf32>
    %141 = arith.mulf %140, %137 : vector<8x64xf32>
    %142 = arith.mulf %141, %137 : vector<8x64xf32>
    %143 = arith.mulf %142, %137 : vector<8x64xf32>
    %144 = arith.addf %137, %143 : vector<8x64xf32>
    %cst_59 = arith.constant 0.797884583 : f32
    %145 = vector.broadcast %cst_59 : f32 to vector<8x64xf32>
    %146 = arith.mulf %145, %144 : vector<8x64xf32>
    %147 = math.tanh %146 : vector<8x64xf32>
    %cst_60 = arith.constant 1.000000e+00 : f32
    %148 = vector.broadcast %cst_60 : f32 to vector<8x64xf32>
    %149 = arith.addf %148, %147 : vector<8x64xf32>
    %150 = arith.mulf %139, %149 : vector<8x64xf32>
    %151 = vector.extract_strided_slice %136 {offsets = [0, 64], sizes = [8, 64], strides = [1, 1]} : vector<8x128xf32> to vector<8x64xf32>
    %152 = arith.mulf %150, %151 : vector<8x64xf32>
    %c0_61 = arith.constant 0 : index
    %c0_62 = arith.constant 0 : index
    %c0_63 = arith.constant 0 : index
    %153 = vector.load %arg9[%c0_61, %c0_62, %c0_63] : memref<3x64x32xf32, #tpu.memory_space<vmem>>, vector<1x64x32xf32>
    %154 = vector.shape_cast %153 : vector<1x64x32xf32> to vector<64x32xf32>
    %cst_64 = arith.constant dense<0.000000e+00> : vector<8x32xf32>
    %155 = tpu.matmul %152, %154, %cst_64 {dimension_numbers = #tpu.dot_dimension_numbers<[1], [0], [0], [1], [0, 0, 1, 1], [], []>} : vector<8x64xf32>, vector<64x32xf32>, vector<8x32xf32> -> vector<8x32xf32>
    %156 = arith.addf %119, %155 : vector<8x32xf32>
    %c1_65 = arith.constant 1 : index
    %c0_66 = arith.constant 0 : index
    %c0_67 = arith.constant 0 : index
    %157 = vector.load %arg4[%c1_65, %c0_66, %c0_67] : memref<3x1x32xf32, #tpu.memory_space<vmem>>, vector<1x1x32xf32>
    %158 = vector.shape_cast %157 : vector<1x1x32xf32> to vector<1x32xf32>
    %159 = arith.mulf %156, %156 : vector<8x32xf32>
    %cst_68 = arith.constant dense<0.000000e+00> : vector<8xf32>
    %160 = vector.multi_reduction <add>, %159, %cst_68 [1] : vector<8x32xf32> to vector<8xf32>
    %161 = vector.shape_cast %160 : vector<8xf32> to vector<8x1xf32>
    %cst_69 = arith.constant 3.200000e+01 : f32
    %162 = vector.broadcast %cst_69 : f32 to vector<8x1xf32>
    %163 = arith.divf %161, %162 : vector<8x1xf32>
    %cst_70 = arith.constant 9.99999997E-7 : f32
    %164 = vector.broadcast %cst_70 : f32 to vector<8x1xf32>
    %165 = arith.addf %163, %164 : vector<8x1xf32>
    %166 = math.rsqrt %165 : vector<8x1xf32>
    %167 = vector.broadcast %166 : vector<8x1xf32> to vector<8x32xf32>
    %168 = arith.mulf %156, %167 : vector<8x32xf32>
    %169 = vector.broadcast %158 : vector<1x32xf32> to vector<8x32xf32>
    %170 = arith.mulf %168, %169 : vector<8x32xf32>
    %c1_71 = arith.constant 1 : index
    %c0_72 = arith.constant 0 : index
    %c0_73 = arith.constant 0 : index
    %171 = vector.load %arg5[%c1_71, %c0_72, %c0_73] : memref<3x32x96xf32, #tpu.memory_space<vmem>>, vector<1x32x96xf32>
    %172 = vector.shape_cast %171 : vector<1x32x96xf32> to vector<32x96xf32>
    %cst_74 = arith.constant dense<0.000000e+00> : vector<8x96xf32>
    %173 = tpu.matmul %170, %172, %cst_74 {dimension_numbers = #tpu.dot_dimension_numbers<[1], [0], [0], [1], [0, 0, 1, 1], [], []>} : vector<8x32xf32>, vector<32x96xf32>, vector<8x96xf32> -> vector<8x96xf32>
    %174 = vector.extract_strided_slice %173 {offsets = [0, 0], sizes = [8, 32], strides = [1, 1]} : vector<8x96xf32> to vector<8x32xf32>
    %175 = vector.extract_strided_slice %173 {offsets = [0, 32], sizes = [8, 32], strides = [1, 1]} : vector<8x96xf32> to vector<8x32xf32>
    %176 = vector.extract_strided_slice %173 {offsets = [0, 64], sizes = [8, 32], strides = [1, 1]} : vector<8x96xf32> to vector<8x32xf32>
    %c1_75 = arith.constant 1 : index
    %c0_76 = arith.constant 0 : index
    %c0_77 = arith.constant 0 : index
    %177 = vector.load %arg6[%c1_75, %c0_76, %c0_77] : memref<3x32x32xf32, #tpu.memory_space<vmem>>, vector<1x32x32xf32>
    %178 = vector.shape_cast %177 : vector<1x32x32xf32> to vector<32x32xf32>
    %cst_78 = arith.constant 0.000000e+00 : f32
    %179 = vector.broadcast %cst_78 : f32 to vector<8x32xf32>
    %180 = vector.extract_strided_slice %174 {offsets = [0, 0], sizes = [8, 8], strides = [1, 1]} : vector<8x32xf32> to vector<8x8xf32>
    %181 = vector.extract_strided_slice %175 {offsets = [0, 0], sizes = [8, 8], strides = [1, 1]} : vector<8x32xf32> to vector<8x8xf32>
    %182 = vector.extract_strided_slice %176 {offsets = [0, 0], sizes = [8, 8], strides = [1, 1]} : vector<8x32xf32> to vector<8x8xf32>
    %cst_79 = arith.constant dense<0.000000e+00> : vector<8x8xf32>
    %183 = tpu.matmul %180, %181, %cst_79 {dimension_numbers = #tpu.dot_dimension_numbers<[1], [1], [0], [0], [0, 0, 1, 0], [], []>} : vector<8x8xf32>, vector<8x8xf32>, vector<8x8xf32> -> vector<8x8xf32>
    %184 = vector.broadcast %3 : vector<1x8xf32> to vector<8x8xf32>
    %185 = arith.addf %183, %184 : vector<8x8xf32>
    %cst_80 = arith.constant dense<0xFF800000> : vector<8xf32>
    %186 = vector.multi_reduction <maximumf>, %185, %cst_80 [1] : vector<8x8xf32> to vector<8xf32>
    %187 = vector.shape_cast %186 : vector<8xf32> to vector<8x1xf32>
    %188 = vector.broadcast %187 : vector<8x1xf32> to vector<8x8xf32>
    %189 = arith.subf %185, %188 : vector<8x8xf32>
    %190 = math.exp %189 : vector<8x8xf32>
    %cst_81 = arith.constant dense<0.000000e+00> : vector<8xf32>
    %191 = vector.multi_reduction <add>, %190, %cst_81 [1] : vector<8x8xf32> to vector<8xf32>
    %192 = vector.shape_cast %191 : vector<8xf32> to vector<8x1xf32>
    %193 = tpu.reciprocal %192 {approx = true} : vector<8x1xf32> -> vector<8x1xf32>
    %194 = vector.broadcast %193 : vector<8x1xf32> to vector<8x8xf32>
    %195 = arith.mulf %190, %194 : vector<8x8xf32>
    %cst_82 = arith.constant dense<0.000000e+00> : vector<8x8xf32>
    %196 = tpu.matmul %195, %182, %cst_82 {dimension_numbers = #tpu.dot_dimension_numbers<[1], [0], [0], [1], [0, 0, 1, 1], [], []>} : vector<8x8xf32>, vector<8x8xf32>, vector<8x8xf32> -> vector<8x8xf32>
    %197 = vector.extract_strided_slice %178 {offsets = [0, 0], sizes = [8, 32], strides = [1, 1]} : vector<32x32xf32> to vector<8x32xf32>
    %cst_83 = arith.constant dense<0.000000e+00> : vector<8x32xf32>
    %198 = tpu.matmul %196, %197, %cst_83 {dimension_numbers = #tpu.dot_dimension_numbers<[1], [0], [0], [1], [0, 0, 1, 1], [], []>} : vector<8x8xf32>, vector<8x32xf32>, vector<8x32xf32> -> vector<8x32xf32>
    %199 = arith.addf %179, %198 : vector<8x32xf32>
    %200 = vector.extract_strided_slice %174 {offsets = [0, 8], sizes = [8, 8], strides = [1, 1]} : vector<8x32xf32> to vector<8x8xf32>
    %201 = vector.extract_strided_slice %175 {offsets = [0, 8], sizes = [8, 8], strides = [1, 1]} : vector<8x32xf32> to vector<8x8xf32>
    %202 = vector.extract_strided_slice %176 {offsets = [0, 8], sizes = [8, 8], strides = [1, 1]} : vector<8x32xf32> to vector<8x8xf32>
    %cst_84 = arith.constant dense<0.000000e+00> : vector<8x8xf32>
    %203 = tpu.matmul %200, %201, %cst_84 {dimension_numbers = #tpu.dot_dimension_numbers<[1], [1], [0], [0], [0, 0, 1, 0], [], []>} : vector<8x8xf32>, vector<8x8xf32>, vector<8x8xf32> -> vector<8x8xf32>
    %204 = vector.broadcast %3 : vector<1x8xf32> to vector<8x8xf32>
    %205 = arith.addf %203, %204 : vector<8x8xf32>
    %cst_85 = arith.constant dense<0xFF800000> : vector<8xf32>
    %206 = vector.multi_reduction <maximumf>, %205, %cst_85 [1] : vector<8x8xf32> to vector<8xf32>
    %207 = vector.shape_cast %206 : vector<8xf32> to vector<8x1xf32>
    %208 = vector.broadcast %207 : vector<8x1xf32> to vector<8x8xf32>
    %209 = arith.subf %205, %208 : vector<8x8xf32>
    %210 = math.exp %209 : vector<8x8xf32>
    %cst_86 = arith.constant dense<0.000000e+00> : vector<8xf32>
    %211 = vector.multi_reduction <add>, %210, %cst_86 [1] : vector<8x8xf32> to vector<8xf32>
    %212 = vector.shape_cast %211 : vector<8xf32> to vector<8x1xf32>
    %213 = tpu.reciprocal %212 {approx = true} : vector<8x1xf32> -> vector<8x1xf32>
    %214 = vector.broadcast %213 : vector<8x1xf32> to vector<8x8xf32>
    %215 = arith.mulf %210, %214 : vector<8x8xf32>
    %cst_87 = arith.constant dense<0.000000e+00> : vector<8x8xf32>
    %216 = tpu.matmul %215, %202, %cst_87 {dimension_numbers = #tpu.dot_dimension_numbers<[1], [0], [0], [1], [0, 0, 1, 1], [], []>} : vector<8x8xf32>, vector<8x8xf32>, vector<8x8xf32> -> vector<8x8xf32>
    %217 = vector.extract_strided_slice %178 {offsets = [8, 0], sizes = [8, 32], strides = [1, 1]} : vector<32x32xf32> to vector<8x32xf32>
    %cst_88 = arith.constant dense<0.000000e+00> : vector<8x32xf32>
    %218 = tpu.matmul %216, %217, %cst_88 {dimension_numbers = #tpu.dot_dimension_numbers<[1], [0], [0], [1], [0, 0, 1, 1], [], []>} : vector<8x8xf32>, vector<8x32xf32>, vector<8x32xf32> -> vector<8x32xf32>
    %219 = arith.addf %199, %218 : vector<8x32xf32>
    %220 = vector.extract_strided_slice %174 {offsets = [0, 16], sizes = [8, 8], strides = [1, 1]} : vector<8x32xf32> to vector<8x8xf32>
    %221 = vector.extract_strided_slice %175 {offsets = [0, 16], sizes = [8, 8], strides = [1, 1]} : vector<8x32xf32> to vector<8x8xf32>
    %222 = vector.extract_strided_slice %176 {offsets = [0, 16], sizes = [8, 8], strides = [1, 1]} : vector<8x32xf32> to vector<8x8xf32>
    %cst_89 = arith.constant dense<0.000000e+00> : vector<8x8xf32>
    %223 = tpu.matmul %220, %221, %cst_89 {dimension_numbers = #tpu.dot_dimension_numbers<[1], [1], [0], [0], [0, 0, 1, 0], [], []>} : vector<8x8xf32>, vector<8x8xf32>, vector<8x8xf32> -> vector<8x8xf32>
    %224 = vector.broadcast %3 : vector<1x8xf32> to vector<8x8xf32>
    %225 = arith.addf %223, %224 : vector<8x8xf32>
    %cst_90 = arith.constant dense<0xFF800000> : vector<8xf32>
    %226 = vector.multi_reduction <maximumf>, %225, %cst_90 [1] : vector<8x8xf32> to vector<8xf32>
    %227 = vector.shape_cast %226 : vector<8xf32> to vector<8x1xf32>
    %228 = vector.broadcast %227 : vector<8x1xf32> to vector<8x8xf32>
    %229 = arith.subf %225, %228 : vector<8x8xf32>
    %230 = math.exp %229 : vector<8x8xf32>
    %cst_91 = arith.constant dense<0.000000e+00> : vector<8xf32>
    %231 = vector.multi_reduction <add>, %230, %cst_91 [1] : vector<8x8xf32> to vector<8xf32>
    %232 = vector.shape_cast %231 : vector<8xf32> to vector<8x1xf32>
    %233 = tpu.reciprocal %232 {approx = true} : vector<8x1xf32> -> vector<8x1xf32>
    %234 = vector.broadcast %233 : vector<8x1xf32> to vector<8x8xf32>
    %235 = arith.mulf %230, %234 : vector<8x8xf32>
    %cst_92 = arith.constant dense<0.000000e+00> : vector<8x8xf32>
    %236 = tpu.matmul %235, %222, %cst_92 {dimension_numbers = #tpu.dot_dimension_numbers<[1], [0], [0], [1], [0, 0, 1, 1], [], []>} : vector<8x8xf32>, vector<8x8xf32>, vector<8x8xf32> -> vector<8x8xf32>
    %237 = vector.extract_strided_slice %178 {offsets = [16, 0], sizes = [8, 32], strides = [1, 1]} : vector<32x32xf32> to vector<8x32xf32>
    %cst_93 = arith.constant dense<0.000000e+00> : vector<8x32xf32>
    %238 = tpu.matmul %236, %237, %cst_93 {dimension_numbers = #tpu.dot_dimension_numbers<[1], [0], [0], [1], [0, 0, 1, 1], [], []>} : vector<8x8xf32>, vector<8x32xf32>, vector<8x32xf32> -> vector<8x32xf32>
    %239 = arith.addf %219, %238 : vector<8x32xf32>
    %240 = vector.extract_strided_slice %174 {offsets = [0, 24], sizes = [8, 8], strides = [1, 1]} : vector<8x32xf32> to vector<8x8xf32>
    %241 = vector.extract_strided_slice %175 {offsets = [0, 24], sizes = [8, 8], strides = [1, 1]} : vector<8x32xf32> to vector<8x8xf32>
    %242 = vector.extract_strided_slice %176 {offsets = [0, 24], sizes = [8, 8], strides = [1, 1]} : vector<8x32xf32> to vector<8x8xf32>
    %cst_94 = arith.constant dense<0.000000e+00> : vector<8x8xf32>
    %243 = tpu.matmul %240, %241, %cst_94 {dimension_numbers = #tpu.dot_dimension_numbers<[1], [1], [0], [0], [0, 0, 1, 0], [], []>} : vector<8x8xf32>, vector<8x8xf32>, vector<8x8xf32> -> vector<8x8xf32>
    %244 = vector.broadcast %3 : vector<1x8xf32> to vector<8x8xf32>
    %245 = arith.addf %243, %244 : vector<8x8xf32>
    %cst_95 = arith.constant dense<0xFF800000> : vector<8xf32>
    %246 = vector.multi_reduction <maximumf>, %245, %cst_95 [1] : vector<8x8xf32> to vector<8xf32>
    %247 = vector.shape_cast %246 : vector<8xf32> to vector<8x1xf32>
    %248 = vector.broadcast %247 : vector<8x1xf32> to vector<8x8xf32>
    %249 = arith.subf %245, %248 : vector<8x8xf32>
    %250 = math.exp %249 : vector<8x8xf32>
    %cst_96 = arith.constant dense<0.000000e+00> : vector<8xf32>
    %251 = vector.multi_reduction <add>, %250, %cst_96 [1] : vector<8x8xf32> to vector<8xf32>
    %252 = vector.shape_cast %251 : vector<8xf32> to vector<8x1xf32>
    %253 = tpu.reciprocal %252 {approx = true} : vector<8x1xf32> -> vector<8x1xf32>
    %254 = vector.broadcast %253 : vector<8x1xf32> to vector<8x8xf32>
    %255 = arith.mulf %250, %254 : vector<8x8xf32>
    %cst_97 = arith.constant dense<0.000000e+00> : vector<8x8xf32>
    %256 = tpu.matmul %255, %242, %cst_97 {dimension_numbers = #tpu.dot_dimension_numbers<[1], [0], [0], [1], [0, 0, 1, 1], [], []>} : vector<8x8xf32>, vector<8x8xf32>, vector<8x8xf32> -> vector<8x8xf32>
    %257 = vector.extract_strided_slice %178 {offsets = [24, 0], sizes = [8, 32], strides = [1, 1]} : vector<32x32xf32> to vector<8x32xf32>
    %cst_98 = arith.constant dense<0.000000e+00> : vector<8x32xf32>
    %258 = tpu.matmul %256, %257, %cst_98 {dimension_numbers = #tpu.dot_dimension_numbers<[1], [0], [0], [1], [0, 0, 1, 1], [], []>} : vector<8x8xf32>, vector<8x32xf32>, vector<8x32xf32> -> vector<8x32xf32>
    %259 = arith.addf %239, %258 : vector<8x32xf32>
    %260 = arith.addf %156, %259 : vector<8x32xf32>
    %c1_99 = arith.constant 1 : index
    %c0_100 = arith.constant 0 : index
    %c0_101 = arith.constant 0 : index
    %261 = vector.load %arg7[%c1_99, %c0_100, %c0_101] : memref<3x1x32xf32, #tpu.memory_space<vmem>>, vector<1x1x32xf32>
    %262 = vector.shape_cast %261 : vector<1x1x32xf32> to vector<1x32xf32>
    %263 = arith.mulf %260, %260 : vector<8x32xf32>
    %cst_102 = arith.constant dense<0.000000e+00> : vector<8xf32>
    %264 = vector.multi_reduction <add>, %263, %cst_102 [1] : vector<8x32xf32> to vector<8xf32>
    %265 = vector.shape_cast %264 : vector<8xf32> to vector<8x1xf32>
    %cst_103 = arith.constant 3.200000e+01 : f32
    %266 = vector.broadcast %cst_103 : f32 to vector<8x1xf32>
    %267 = arith.divf %265, %266 : vector<8x1xf32>
    %cst_104 = arith.constant 9.99999997E-7 : f32
    %268 = vector.broadcast %cst_104 : f32 to vector<8x1xf32>
    %269 = arith.addf %267, %268 : vector<8x1xf32>
    %270 = math.rsqrt %269 : vector<8x1xf32>
    %271 = vector.broadcast %270 : vector<8x1xf32> to vector<8x32xf32>
    %272 = arith.mulf %260, %271 : vector<8x32xf32>
    %273 = vector.broadcast %262 : vector<1x32xf32> to vector<8x32xf32>
    %274 = arith.mulf %272, %273 : vector<8x32xf32>
    %c1_105 = arith.constant 1 : index
    %c0_106 = arith.constant 0 : index
    %c0_107 = arith.constant 0 : index
    %275 = vector.load %arg8[%c1_105, %c0_106, %c0_107] : memref<3x32x128xf32, #tpu.memory_space<vmem>>, vector<1x32x128xf32>
    %276 = vector.shape_cast %275 : vector<1x32x128xf32> to vector<32x128xf32>
    %cst_108 = arith.constant dense<0.000000e+00> : vector<8x128xf32>
    %277 = tpu.matmul %274, %276, %cst_108 {dimension_numbers = #tpu.dot_dimension_numbers<[1], [0], [0], [1], [0, 0, 1, 1], [], []>} : vector<8x32xf32>, vector<32x128xf32>, vector<8x128xf32> -> vector<8x128xf32>
    %278 = vector.extract_strided_slice %277 {offsets = [0, 0], sizes = [8, 64], strides = [1, 1]} : vector<8x128xf32> to vector<8x64xf32>
    %cst_109 = arith.constant 5.000000e-01 : f32
    %279 = vector.broadcast %cst_109 : f32 to vector<8x64xf32>
    %280 = arith.mulf %279, %278 : vector<8x64xf32>
    %cst_110 = arith.constant 4.471500e-02 : f32
    %281 = vector.broadcast %cst_110 : f32 to vector<8x64xf32>
    %282 = arith.mulf %281, %278 : vector<8x64xf32>
    %283 = arith.mulf %282, %278 : vector<8x64xf32>
    %284 = arith.mulf %283, %278 : vector<8x64xf32>
    %285 = arith.addf %278, %284 : vector<8x64xf32>
    %cst_111 = arith.constant 0.797884583 : f32
    %286 = vector.broadcast %cst_111 : f32 to vector<8x64xf32>
    %287 = arith.mulf %286, %285 : vector<8x64xf32>
    %288 = math.tanh %287 : vector<8x64xf32>
    %cst_112 = arith.constant 1.000000e+00 : f32
    %289 = vector.broadcast %cst_112 : f32 to vector<8x64xf32>
    %290 = arith.addf %289, %288 : vector<8x64xf32>
    %291 = arith.mulf %280, %290 : vector<8x64xf32>
    %292 = vector.extract_strided_slice %277 {offsets = [0, 64], sizes = [8, 64], strides = [1, 1]} : vector<8x128xf32> to vector<8x64xf32>
    %293 = arith.mulf %291, %292 : vector<8x64xf32>
    %c1_113 = arith.constant 1 : index
    %c0_114 = arith.constant 0 : index
    %c0_115 = arith.constant 0 : index
    %294 = vector.load %arg9[%c1_113, %c0_114, %c0_115] : memref<3x64x32xf32, #tpu.memory_space<vmem>>, vector<1x64x32xf32>
    %295 = vector.shape_cast %294 : vector<1x64x32xf32> to vector<64x32xf32>
    %cst_116 = arith.constant dense<0.000000e+00> : vector<8x32xf32>
    %296 = tpu.matmul %293, %295, %cst_116 {dimension_numbers = #tpu.dot_dimension_numbers<[1], [0], [0], [1], [0, 0, 1, 1], [], []>} : vector<8x64xf32>, vector<64x32xf32>, vector<8x32xf32> -> vector<8x32xf32>
    %297 = arith.addf %260, %296 : vector<8x32xf32>
    %c2_117 = arith.constant 2 : index
    %c0_118 = arith.constant 0 : index
    %c0_119 = arith.constant 0 : index
    %298 = vector.load %arg4[%c2_117, %c0_118, %c0_119] : memref<3x1x32xf32, #tpu.memory_space<vmem>>, vector<1x1x32xf32>
    %299 = vector.shape_cast %298 : vector<1x1x32xf32> to vector<1x32xf32>
    %300 = arith.mulf %297, %297 : vector<8x32xf32>
    %cst_120 = arith.constant dense<0.000000e+00> : vector<8xf32>
    %301 = vector.multi_reduction <add>, %300, %cst_120 [1] : vector<8x32xf32> to vector<8xf32>
    %302 = vector.shape_cast %301 : vector<8xf32> to vector<8x1xf32>
    %cst_121 = arith.constant 3.200000e+01 : f32
    %303 = vector.broadcast %cst_121 : f32 to vector<8x1xf32>
    %304 = arith.divf %302, %303 : vector<8x1xf32>
    %cst_122 = arith.constant 9.99999997E-7 : f32
    %305 = vector.broadcast %cst_122 : f32 to vector<8x1xf32>
    %306 = arith.addf %304, %305 : vector<8x1xf32>
    %307 = math.rsqrt %306 : vector<8x1xf32>
    %308 = vector.broadcast %307 : vector<8x1xf32> to vector<8x32xf32>
    %309 = arith.mulf %297, %308 : vector<8x32xf32>
    %310 = vector.broadcast %299 : vector<1x32xf32> to vector<8x32xf32>
    %311 = arith.mulf %309, %310 : vector<8x32xf32>
    %c2_123 = arith.constant 2 : index
    %c0_124 = arith.constant 0 : index
    %c0_125 = arith.constant 0 : index
    %312 = vector.load %arg5[%c2_123, %c0_124, %c0_125] : memref<3x32x96xf32, #tpu.memory_space<vmem>>, vector<1x32x96xf32>
    %313 = vector.shape_cast %312 : vector<1x32x96xf32> to vector<32x96xf32>
    %cst_126 = arith.constant dense<0.000000e+00> : vector<8x96xf32>
    %314 = tpu.matmul %311, %313, %cst_126 {dimension_numbers = #tpu.dot_dimension_numbers<[1], [0], [0], [1], [0, 0, 1, 1], [], []>} : vector<8x32xf32>, vector<32x96xf32>, vector<8x96xf32> -> vector<8x96xf32>
    %315 = vector.extract_strided_slice %314 {offsets = [0, 0], sizes = [8, 32], strides = [1, 1]} : vector<8x96xf32> to vector<8x32xf32>
    %316 = vector.extract_strided_slice %314 {offsets = [0, 32], sizes = [8, 32], strides = [1, 1]} : vector<8x96xf32> to vector<8x32xf32>
    %317 = vector.extract_strided_slice %314 {offsets = [0, 64], sizes = [8, 32], strides = [1, 1]} : vector<8x96xf32> to vector<8x32xf32>
    %c2_127 = arith.constant 2 : index
    %c0_128 = arith.constant 0 : index
    %c0_129 = arith.constant 0 : index
    %318 = vector.load %arg6[%c2_127, %c0_128, %c0_129] : memref<3x32x32xf32, #tpu.memory_space<vmem>>, vector<1x32x32xf32>
    %319 = vector.shape_cast %318 : vector<1x32x32xf32> to vector<32x32xf32>
    %cst_130 = arith.constant 0.000000e+00 : f32
    %320 = vector.broadcast %cst_130 : f32 to vector<8x32xf32>
    %321 = vector.extract_strided_slice %315 {offsets = [0, 0], sizes = [8, 8], strides = [1, 1]} : vector<8x32xf32> to vector<8x8xf32>
    %322 = vector.extract_strided_slice %316 {offsets = [0, 0], sizes = [8, 8], strides = [1, 1]} : vector<8x32xf32> to vector<8x8xf32>
    %323 = vector.extract_strided_slice %317 {offsets = [0, 0], sizes = [8, 8], strides = [1, 1]} : vector<8x32xf32> to vector<8x8xf32>
    %cst_131 = arith.constant dense<0.000000e+00> : vector<8x8xf32>
    %324 = tpu.matmul %321, %322, %cst_131 {dimension_numbers = #tpu.dot_dimension_numbers<[1], [1], [0], [0], [0, 0, 1, 0], [], []>} : vector<8x8xf32>, vector<8x8xf32>, vector<8x8xf32> -> vector<8x8xf32>
    %325 = vector.broadcast %3 : vector<1x8xf32> to vector<8x8xf32>
    %326 = arith.addf %324, %325 : vector<8x8xf32>
    %cst_132 = arith.constant dense<0xFF800000> : vector<8xf32>
    %327 = vector.multi_reduction <maximumf>, %326, %cst_132 [1] : vector<8x8xf32> to vector<8xf32>
    %328 = vector.shape_cast %327 : vector<8xf32> to vector<8x1xf32>
    %329 = vector.broadcast %328 : vector<8x1xf32> to vector<8x8xf32>
    %330 = arith.subf %326, %329 : vector<8x8xf32>
    %331 = math.exp %330 : vector<8x8xf32>
    %cst_133 = arith.constant dense<0.000000e+00> : vector<8xf32>
    %332 = vector.multi_reduction <add>, %331, %cst_133 [1] : vector<8x8xf32> to vector<8xf32>
    %333 = vector.shape_cast %332 : vector<8xf32> to vector<8x1xf32>
    %334 = tpu.reciprocal %333 {approx = true} : vector<8x1xf32> -> vector<8x1xf32>
    %335 = vector.broadcast %334 : vector<8x1xf32> to vector<8x8xf32>
    %336 = arith.mulf %331, %335 : vector<8x8xf32>
    %cst_134 = arith.constant dense<0.000000e+00> : vector<8x8xf32>
    %337 = tpu.matmul %336, %323, %cst_134 {dimension_numbers = #tpu.dot_dimension_numbers<[1], [0], [0], [1], [0, 0, 1, 1], [], []>} : vector<8x8xf32>, vector<8x8xf32>, vector<8x8xf32> -> vector<8x8xf32>
    %338 = vector.extract_strided_slice %319 {offsets = [0, 0], sizes = [8, 32], strides = [1, 1]} : vector<32x32xf32> to vector<8x32xf32>
    %cst_135 = arith.constant dense<0.000000e+00> : vector<8x32xf32>
    %339 = tpu.matmul %337, %338, %cst_135 {dimension_numbers = #tpu.dot_dimension_numbers<[1], [0], [0], [1], [0, 0, 1, 1], [], []>} : vector<8x8xf32>, vector<8x32xf32>, vector<8x32xf32> -> vector<8x32xf32>
    %340 = arith.addf %320, %339 : vector<8x32xf32>
    %341 = vector.extract_strided_slice %315 {offsets = [0, 8], sizes = [8, 8], strides = [1, 1]} : vector<8x32xf32> to vector<8x8xf32>
    %342 = vector.extract_strided_slice %316 {offsets = [0, 8], sizes = [8, 8], strides = [1, 1]} : vector<8x32xf32> to vector<8x8xf32>
    %343 = vector.extract_strided_slice %317 {offsets = [0, 8], sizes = [8, 8], strides = [1, 1]} : vector<8x32xf32> to vector<8x8xf32>
    %cst_136 = arith.constant dense<0.000000e+00> : vector<8x8xf32>
    %344 = tpu.matmul %341, %342, %cst_136 {dimension_numbers = #tpu.dot_dimension_numbers<[1], [1], [0], [0], [0, 0, 1, 0], [], []>} : vector<8x8xf32>, vector<8x8xf32>, vector<8x8xf32> -> vector<8x8xf32>
    %345 = vector.broadcast %3 : vector<1x8xf32> to vector<8x8xf32>
    %346 = arith.addf %344, %345 : vector<8x8xf32>
    %cst_137 = arith.constant dense<0xFF800000> : vector<8xf32>
    %347 = vector.multi_reduction <maximumf>, %346, %cst_137 [1] : vector<8x8xf32> to vector<8xf32>
    %348 = vector.shape_cast %347 : vector<8xf32> to vector<8x1xf32>
    %349 = vector.broadcast %348 : vector<8x1xf32> to vector<8x8xf32>
    %350 = arith.subf %346, %349 : vector<8x8xf32>
    %351 = math.exp %350 : vector<8x8xf32>
    %cst_138 = arith.constant dense<0.000000e+00> : vector<8xf32>
    %352 = vector.multi_reduction <add>, %351, %cst_138 [1] : vector<8x8xf32> to vector<8xf32>
    %353 = vector.shape_cast %352 : vector<8xf32> to vector<8x1xf32>
    %354 = tpu.reciprocal %353 {approx = true} : vector<8x1xf32> -> vector<8x1xf32>
    %355 = vector.broadcast %354 : vector<8x1xf32> to vector<8x8xf32>
    %356 = arith.mulf %351, %355 : vector<8x8xf32>
    %cst_139 = arith.constant dense<0.000000e+00> : vector<8x8xf32>
    %357 = tpu.matmul %356, %343, %cst_139 {dimension_numbers = #tpu.dot_dimension_numbers<[1], [0], [0], [1], [0, 0, 1, 1], [], []>} : vector<8x8xf32>, vector<8x8xf32>, vector<8x8xf32> -> vector<8x8xf32>
    %358 = vector.extract_strided_slice %319 {offsets = [8, 0], sizes = [8, 32], strides = [1, 1]} : vector<32x32xf32> to vector<8x32xf32>
    %cst_140 = arith.constant dense<0.000000e+00> : vector<8x32xf32>
    %359 = tpu.matmul %357, %358, %cst_140 {dimension_numbers = #tpu.dot_dimension_numbers<[1], [0], [0], [1], [0, 0, 1, 1], [], []>} : vector<8x8xf32>, vector<8x32xf32>, vector<8x32xf32> -> vector<8x32xf32>
    %360 = arith.addf %340, %359 : vector<8x32xf32>
    %361 = vector.extract_strided_slice %315 {offsets = [0, 16], sizes = [8, 8], strides = [1, 1]} : vector<8x32xf32> to vector<8x8xf32>
    %362 = vector.extract_strided_slice %316 {offsets = [0, 16], sizes = [8, 8], strides = [1, 1]} : vector<8x32xf32> to vector<8x8xf32>
    %363 = vector.extract_strided_slice %317 {offsets = [0, 16], sizes = [8, 8], strides = [1, 1]} : vector<8x32xf32> to vector<8x8xf32>
    %cst_141 = arith.constant dense<0.000000e+00> : vector<8x8xf32>
    %364 = tpu.matmul %361, %362, %cst_141 {dimension_numbers = #tpu.dot_dimension_numbers<[1], [1], [0], [0], [0, 0, 1, 0], [], []>} : vector<8x8xf32>, vector<8x8xf32>, vector<8x8xf32> -> vector<8x8xf32>
    %365 = vector.broadcast %3 : vector<1x8xf32> to vector<8x8xf32>
    %366 = arith.addf %364, %365 : vector<8x8xf32>
    %cst_142 = arith.constant dense<0xFF800000> : vector<8xf32>
    %367 = vector.multi_reduction <maximumf>, %366, %cst_142 [1] : vector<8x8xf32> to vector<8xf32>
    %368 = vector.shape_cast %367 : vector<8xf32> to vector<8x1xf32>
    %369 = vector.broadcast %368 : vector<8x1xf32> to vector<8x8xf32>
    %370 = arith.subf %366, %369 : vector<8x8xf32>
    %371 = math.exp %370 : vector<8x8xf32>
    %cst_143 = arith.constant dense<0.000000e+00> : vector<8xf32>
    %372 = vector.multi_reduction <add>, %371, %cst_143 [1] : vector<8x8xf32> to vector<8xf32>
    %373 = vector.shape_cast %372 : vector<8xf32> to vector<8x1xf32>
    %374 = tpu.reciprocal %373 {approx = true} : vector<8x1xf32> -> vector<8x1xf32>
    %375 = vector.broadcast %374 : vector<8x1xf32> to vector<8x8xf32>
    %376 = arith.mulf %371, %375 : vector<8x8xf32>
    %cst_144 = arith.constant dense<0.000000e+00> : vector<8x8xf32>
    %377 = tpu.matmul %376, %363, %cst_144 {dimension_numbers = #tpu.dot_dimension_numbers<[1], [0], [0], [1], [0, 0, 1, 1], [], []>} : vector<8x8xf32>, vector<8x8xf32>, vector<8x8xf32> -> vector<8x8xf32>
    %378 = vector.extract_strided_slice %319 {offsets = [16, 0], sizes = [8, 32], strides = [1, 1]} : vector<32x32xf32> to vector<8x32xf32>
    %cst_145 = arith.constant dense<0.000000e+00> : vector<8x32xf32>
    %379 = tpu.matmul %377, %378, %cst_145 {dimension_numbers = #tpu.dot_dimension_numbers<[1], [0], [0], [1], [0, 0, 1, 1], [], []>} : vector<8x8xf32>, vector<8x32xf32>, vector<8x32xf32> -> vector<8x32xf32>
    %380 = arith.addf %360, %379 : vector<8x32xf32>
    %381 = vector.extract_strided_slice %315 {offsets = [0, 24], sizes = [8, 8], strides = [1, 1]} : vector<8x32xf32> to vector<8x8xf32>
    %382 = vector.extract_strided_slice %316 {offsets = [0, 24], sizes = [8, 8], strides = [1, 1]} : vector<8x32xf32> to vector<8x8xf32>
    %383 = vector.extract_strided_slice %317 {offsets = [0, 24], sizes = [8, 8], strides = [1, 1]} : vector<8x32xf32> to vector<8x8xf32>
    %cst_146 = arith.constant dense<0.000000e+00> : vector<8x8xf32>
    %384 = tpu.matmul %381, %382, %cst_146 {dimension_numbers = #tpu.dot_dimension_numbers<[1], [1], [0], [0], [0, 0, 1, 0], [], []>} : vector<8x8xf32>, vector<8x8xf32>, vector<8x8xf32> -> vector<8x8xf32>
    %385 = vector.broadcast %3 : vector<1x8xf32> to vector<8x8xf32>
    %386 = arith.addf %384, %385 : vector<8x8xf32>
    %cst_147 = arith.constant dense<0xFF800000> : vector<8xf32>
    %387 = vector.multi_reduction <maximumf>, %386, %cst_147 [1] : vector<8x8xf32> to vector<8xf32>
    %388 = vector.shape_cast %387 : vector<8xf32> to vector<8x1xf32>
    %389 = vector.broadcast %388 : vector<8x1xf32> to vector<8x8xf32>
    %390 = arith.subf %386, %389 : vector<8x8xf32>
    %391 = math.exp %390 : vector<8x8xf32>
    %cst_148 = arith.constant dense<0.000000e+00> : vector<8xf32>
    %392 = vector.multi_reduction <add>, %391, %cst_148 [1] : vector<8x8xf32> to vector<8xf32>
    %393 = vector.shape_cast %392 : vector<8xf32> to vector<8x1xf32>
    %394 = tpu.reciprocal %393 {approx = true} : vector<8x1xf32> -> vector<8x1xf32>
    %395 = vector.broadcast %394 : vector<8x1xf32> to vector<8x8xf32>
    %396 = arith.mulf %391, %395 : vector<8x8xf32>
    %cst_149 = arith.constant dense<0.000000e+00> : vector<8x8xf32>
    %397 = tpu.matmul %396, %383, %cst_149 {dimension_numbers = #tpu.dot_dimension_numbers<[1], [0], [0], [1], [0, 0, 1, 1], [], []>} : vector<8x8xf32>, vector<8x8xf32>, vector<8x8xf32> -> vector<8x8xf32>
    %398 = vector.extract_strided_slice %319 {offsets = [24, 0], sizes = [8, 32], strides = [1, 1]} : vector<32x32xf32> to vector<8x32xf32>
    %cst_150 = arith.constant dense<0.000000e+00> : vector<8x32xf32>
    %399 = tpu.matmul %397, %398, %cst_150 {dimension_numbers = #tpu.dot_dimension_numbers<[1], [0], [0], [1], [0, 0, 1, 1], [], []>} : vector<8x8xf32>, vector<8x32xf32>, vector<8x32xf32> -> vector<8x32xf32>
    %400 = arith.addf %380, %399 : vector<8x32xf32>
    %401 = arith.addf %297, %400 : vector<8x32xf32>
    %c2_151 = arith.constant 2 : index
    %c0_152 = arith.constant 0 : index
    %c0_153 = arith.constant 0 : index
    %402 = vector.load %arg7[%c2_151, %c0_152, %c0_153] : memref<3x1x32xf32, #tpu.memory_space<vmem>>, vector<1x1x32xf32>
    %403 = vector.shape_cast %402 : vector<1x1x32xf32> to vector<1x32xf32>
    %404 = arith.mulf %401, %401 : vector<8x32xf32>
    %cst_154 = arith.constant dense<0.000000e+00> : vector<8xf32>
    %405 = vector.multi_reduction <add>, %404, %cst_154 [1] : vector<8x32xf32> to vector<8xf32>
    %406 = vector.shape_cast %405 : vector<8xf32> to vector<8x1xf32>
    %cst_155 = arith.constant 3.200000e+01 : f32
    %407 = vector.broadcast %cst_155 : f32 to vector<8x1xf32>
    %408 = arith.divf %406, %407 : vector<8x1xf32>
    %cst_156 = arith.constant 9.99999997E-7 : f32
    %409 = vector.broadcast %cst_156 : f32 to vector<8x1xf32>
    %410 = arith.addf %408, %409 : vector<8x1xf32>
    %411 = math.rsqrt %410 : vector<8x1xf32>
    %412 = vector.broadcast %411 : vector<8x1xf32> to vector<8x32xf32>
    %413 = arith.mulf %401, %412 : vector<8x32xf32>
    %414 = vector.broadcast %403 : vector<1x32xf32> to vector<8x32xf32>
    %415 = arith.mulf %413, %414 : vector<8x32xf32>
    %c2_157 = arith.constant 2 : index
    %c0_158 = arith.constant 0 : index
    %c0_159 = arith.constant 0 : index
    %416 = vector.load %arg8[%c2_157, %c0_158, %c0_159] : memref<3x32x128xf32, #tpu.memory_space<vmem>>, vector<1x32x128xf32>
    %417 = vector.shape_cast %416 : vector<1x32x128xf32> to vector<32x128xf32>
    %cst_160 = arith.constant dense<0.000000e+00> : vector<8x128xf32>
    %418 = tpu.matmul %415, %417, %cst_160 {dimension_numbers = #tpu.dot_dimension_numbers<[1], [0], [0], [1], [0, 0, 1, 1], [], []>} : vector<8x32xf32>, vector<32x128xf32>, vector<8x128xf32> -> vector<8x128xf32>
    %419 = vector.extract_strided_slice %418 {offsets = [0, 0], sizes = [8, 64], strides = [1, 1]} : vector<8x128xf32> to vector<8x64xf32>
    %cst_161 = arith.constant 5.000000e-01 : f32
    %420 = vector.broadcast %cst_161 : f32 to vector<8x64xf32>
    %421 = arith.mulf %420, %419 : vector<8x64xf32>
    %cst_162 = arith.constant 4.471500e-02 : f32
    %422 = vector.broadcast %cst_162 : f32 to vector<8x64xf32>
    %423 = arith.mulf %422, %419 : vector<8x64xf32>
    %424 = arith.mulf %423, %419 : vector<8x64xf32>
    %425 = arith.mulf %424, %419 : vector<8x64xf32>
    %426 = arith.addf %419, %425 : vector<8x64xf32>
    %cst_163 = arith.constant 0.797884583 : f32
    %427 = vector.broadcast %cst_163 : f32 to vector<8x64xf32>
    %428 = arith.mulf %427, %426 : vector<8x64xf32>
    %429 = math.tanh %428 : vector<8x64xf32>
    %cst_164 = arith.constant 1.000000e+00 : f32
    %430 = vector.broadcast %cst_164 : f32 to vector<8x64xf32>
    %431 = arith.addf %430, %429 : vector<8x64xf32>
    %432 = arith.mulf %421, %431 : vector<8x64xf32>
    %433 = vector.extract_strided_slice %418 {offsets = [0, 64], sizes = [8, 64], strides = [1, 1]} : vector<8x128xf32> to vector<8x64xf32>
    %434 = arith.mulf %432, %433 : vector<8x64xf32>
    %c2_165 = arith.constant 2 : index
    %c0_166 = arith.constant 0 : index
    %c0_167 = arith.constant 0 : index
    %435 = vector.load %arg9[%c2_165, %c0_166, %c0_167] : memref<3x64x32xf32, #tpu.memory_space<vmem>>, vector<1x64x32xf32>
    %436 = vector.shape_cast %435 : vector<1x64x32xf32> to vector<64x32xf32>
    %cst_168 = arith.constant dense<0.000000e+00> : vector<8x32xf32>
    %437 = tpu.matmul %434, %436, %cst_168 {dimension_numbers = #tpu.dot_dimension_numbers<[1], [0], [0], [1], [0, 0, 1, 1], [], []>} : vector<8x64xf32>, vector<64x32xf32>, vector<8x32xf32> -> vector<8x32xf32>
    %438 = arith.addf %401, %437 : vector<8x32xf32>
    %c0_169 = arith.constant 0 : index
    %c0_170 = arith.constant 0 : index
    %439 = vector.load %arg10[%c0_169, %c0_170] : memref<1x32xf32, #tpu.memory_space<vmem>>, vector<1x32xf32>
    %440 = vector.extract_strided_slice %438 {offsets = [0, 0], sizes = [1, 32], strides = [1, 1]} : vector<8x32xf32> to vector<1x32xf32>
    %441 = arith.mulf %440, %440 : vector<1x32xf32>
    %cst_171 = arith.constant dense<0.000000e+00> : vector<1xf32>
    %442 = vector.multi_reduction <add>, %441, %cst_171 [1] : vector<1x32xf32> to vector<1xf32>
    %443 = vector.shape_cast %442 : vector<1xf32> to vector<1x1xf32>
    %cst_172 = arith.constant 3.200000e+01 : f32
    %444 = vector.broadcast %cst_172 : f32 to vector<1x1xf32>
    %445 = arith.divf %443, %444 : vector<1x1xf32>
    %cst_173 = arith.constant 9.99999997E-7 : f32
    %446 = vector.broadcast %cst_173 : f32 to vector<1x1xf32>
    %447 = arith.addf %445, %446 : vector<1x1xf32>
    %448 = math.rsqrt %447 : vector<1x1xf32>
    %449 = vector.broadcast %448 : vector<1x1xf32> to vector<1x32xf32>
    %450 = arith.mulf %440, %449 : vector<1x32xf32>
    %451 = arith.mulf %450, %439 : vector<1x32xf32>
    %452 = arith.mulf %451, %451 : vector<1x32xf32>
    %cst_174 = arith.constant dense<0.000000e+00> : vector<1xf32>
    %453 = vector.multi_reduction <add>, %452, %cst_174 [1] : vector<1x32xf32> to vector<1xf32>
    %454 = vector.shape_cast %453 : vector<1xf32> to vector<1x1xf32>
    %cst_175 = arith.constant 3.200000e+01 : f32
    %455 = vector.broadcast %cst_175 : f32 to vector<1x1xf32>
    %456 = arith.divf %454, %455 : vector<1x1xf32>
    %cst_176 = arith.constant 9.99999997E-7 : f32
    %457 = vector.broadcast %cst_176 : f32 to vector<1x1xf32>
    %458 = arith.addf %456, %457 : vector<1x1xf32>
    %459 = math.rsqrt %458 : vector<1x1xf32>
    %460 = vector.broadcast %459 : vector<1x1xf32> to vector<1x32xf32>
    %461 = arith.mulf %451, %460 : vector<1x32xf32>
    %462 = arith.mulf %461, %439 : vector<1x32xf32>
    %c0_177 = arith.constant 0 : index
    %c0_178 = arith.constant 0 : index
    %463 = vector.load %arg11[%c0_177, %c0_178] : memref<32x32xf32, #tpu.memory_space<vmem>>, vector<32x32xf32>
    %cst_179 = arith.constant dense<0.000000e+00> : vector<1x32xf32>
    %464 = tpu.matmul %462, %463, %cst_179 {dimension_numbers = #tpu.dot_dimension_numbers<[1], [0], [0], [1], [0, 0, 1, 1], [], []>} : vector<1x32xf32>, vector<32x32xf32>, vector<1x32xf32> -> vector<1x32xf32>
    %c0_180 = arith.constant 0 : index
    %c0_181 = arith.constant 0 : index
    %465 = vector.load %arg12[%c0_180, %c0_181] : memref<1x32xf32, #tpu.memory_space<vmem>>, vector<1x32xf32>
    %466 = arith.addf %464, %465 : vector<1x32xf32>
    %467 = math.tanh %466 : vector<1x32xf32>
    %c0_182 = arith.constant 0 : index
    %c0_183 = arith.constant 0 : index
    %468 = vector.load %arg13[%c0_182, %c0_183] : memref<32x128xf32, #tpu.memory_space<vmem>>, vector<32x128xf32>
    %cst_184 = arith.constant dense<0.000000e+00> : vector<1x128xf32>
    %469 = tpu.matmul %467, %468, %cst_184 {dimension_numbers = #tpu.dot_dimension_numbers<[1], [0], [0], [1], [0, 0, 1, 1], [], []>} : vector<1x32xf32>, vector<32x128xf32>, vector<1x128xf32> -> vector<1x128xf32>
    %c0_185 = arith.constant 0 : index
    %c0_186 = arith.constant 0 : index
    %470 = vector.load %arg14[%c0_185, %c0_186] : memref<1x128xf32, #tpu.memory_space<vmem>>, vector<1x128xf32>
    %471 = arith.addf %469, %470 : vector<1x128xf32>
    %c0_187 = arith.constant 0 : index
    %c0_188 = arith.constant 0 : index
    %c0_189 = arith.constant 0 : index
    %472 = vector.load %arg15[%c0_187, %c0_188, %c0_189] : memref<1x1x128xf32, #tpu.memory_space<vmem>>, vector<1x1x128xf32>
    %473 = vector.shape_cast %472 : vector<1x1x128xf32> to vector<1x128xf32>
    %474 = vector.shape_cast %471 : vector<1x128xf32> to vector<1x1x128xf32>
    tpu.vector_store %arg15[%c0_187, %c0_188, %c0_189], %474 {strides = array<i32>} : memref<1x1x128xf32, #tpu.memory_space<vmem>>, vector<1x1x128xf32>,
    return
  }
  func.func @transform_0(%arg0: i32) -> (i32, i32, i32) {
    %c0_i32 = arith.constant 0 : i32
    %c0_i32_0 = arith.constant 0 : i32
    %c0_i32_1 = arith.constant 0 : i32
    return %arg0, %c0_i32, %c0_i32_0 : i32, i32, i32
  }
  func.func @transform_1(%arg0: i32) -> (i32, i32, i32) {
    %c0_i32 = arith.constant 0 : i32
    %c0_i32_0 = arith.constant 0 : i32
    %c0_i32_1 = arith.constant 0 : i32
    return %arg0, %c0_i32, %c0_i32_0 : i32, i32, i32
  }
  func.func @transform_2(%arg0: i32) -> (i32, i32, i32) {
    %c0_i32 = arith.constant 0 : i32
    %c0_i32_0 = arith.constant 0 : i32
    %c0_i32_1 = arith.constant 0 : i32
    %c0_i32_2 = arith.constant 0 : i32
    return %c0_i32, %c0_i32_0, %c0_i32_1 : i32, i32, i32
  }
  func.func @transform_3(%arg0: i32) -> (i32, i32, i32) {
    %c0_i32 = arith.constant 0 : i32
    %c0_i32_0 = arith.constant 0 : i32
    %c0_i32_1 = arith.constant 0 : i32
    %c0_i32_2 = arith.constant 0 : i32
    return %c0_i32, %c0_i32_0, %c0_i32_1 : i32, i32, i32
  }
  func.func @transform_4(%arg0: i32) -> (i32, i32, i32) {
    %c0_i32 = arith.constant 0 : i32
    %c0_i32_0 = arith.constant 0 : i32
    %c0_i32_1 = arith.constant 0 : i32
    %c0_i32_2 = arith.constant 0 : i32
    return %c0_i32, %c0_i32_0, %c0_i32_1 : i32, i32, i32
  }
  func.func @transform_5(%arg0: i32) -> (i32, i32, i32) {
    %c0_i32 = arith.constant 0 : i32
    %c0_i32_0 = arith.constant 0 : i32
    %c0_i32_1 = arith.constant 0 : i32
    %c0_i32_2 = arith.constant 0 : i32
    return %c0_i32, %c0_i32_0, %c0_i32_1 : i32, i32, i32
  }
  func.func @transform_6(%arg0: i32) -> (i32, i32, i32) {
    %c0_i32 = arith.constant 0 : i32
    %c0_i32_0 = arith.constant 0 : i32
    %c0_i32_1 = arith.constant 0 : i32
    %c0_i32_2 = arith.constant 0 : i32
    return %c0_i32, %c0_i32_0, %c0_i32_1 : i32, i32, i32
  }
  func.func @transform_7(%arg0: i32) -> (i32, i32, i32) {
    %c0_i32 = arith.constant 0 : i32
    %c0_i32_0 = arith.constant 0 : i32
    %c0_i32_1 = arith.constant 0 : i32
    %c0_i32_2 = arith.constant 0 : i32
    return %c0_i32, %c0_i32_0, %c0_i32_1 : i32, i32, i32
  }
  func.func @transform_8(%arg0: i32) -> (i32, i32, i32) {
    %c0_i32 = arith.constant 0 : i32
    %c0_i32_0 = arith.constant 0 : i32
    %c0_i32_1 = arith.constant 0 : i32
    %c0_i32_2 = arith.constant 0 : i32
    return %c0_i32, %c0_i32_0, %c0_i32_1 : i32, i32, i32
  }
  func.func @transform_9(%arg0: i32) -> (i32, i32) {
    %c0_i32 = arith.constant 0 : i32
    %c0_i32_0 = arith.constant 0 : i32
    %c0_i32_1 = arith.constant 0 : i32
    return %c0_i32, %c0_i32_0 : i32, i32
  }
  func.func @transform_10(%arg0: i32) -> (i32, i32) {
    %c0_i32 = arith.constant 0 : i32
    %c0_i32_0 = arith.constant 0 : i32
    %c0_i32_1 = arith.constant 0 : i32
    return %c0_i32, %c0_i32_0 : i32, i32
  }
  func.func @transform_11(%arg0: i32) -> (i32, i32) {
    %c0_i32 = arith.constant 0 : i32
    %c0_i32_0 = arith.constant 0 : i32
    %c0_i32_1 = arith.constant 0 : i32
    return %c0_i32, %c0_i32_0 : i32, i32
  }
  func.func @transform_12(%arg0: i32) -> (i32, i32) {
    %c0_i32 = arith.constant 0 : i32
    %c0_i32_0 = arith.constant 0 : i32
    %c0_i32_1 = arith.constant 0 : i32
    return %c0_i32, %c0_i32_0 : i32, i32
  }
  func.func @transform_13(%arg0: i32) -> (i32, i32) {
    %c0_i32 = arith.constant 0 : i32
    %c0_i32_0 = arith.constant 0 : i32
    %c0_i32_1 = arith.constant 0 : i32
    return %c0_i32, %c0_i32_0 : i32, i32
  }
  func.func @transform_14(%arg0: i32) -> (i32, i32, i32) {
    %c0_i32 = arith.constant 0 : i32
    %c0_i32_0 = arith.constant 0 : i32
    %c0_i32_1 = arith.constant 0 : i32
    return %arg0, %c0_i32, %c0_i32_0 : i32, i32, i32
  }
}

</mosaic_0001>

<bundles_post_ra>
// kernel: model_forward.1
= control target key start
LH: loop header
LB: loop body
LE: loop exit
PB: predicated region body
PF: predicated region fallthrough
CT: control target
= control target key end

     0   :  { %s6102_s0 = inlined_call_operand.vmem [shape: f32[2,8,32], index: 0, kind: input, shape index: {}]   ;;  %s6103_s1 = inlined_call_operand.vmem [shape: f32[2,1,8], index: 1, kind: input, shape index: {}]   ;;  %s6104_s2 = inlined_call_operand.vmem [shape: f32[4,8,8], index: 2, kind: input, shape index: {}]   ;;  %s6105_s3 = inlined_call_operand.vmem [shape: f32[3,1,32], index: 3, kind: input, shape index: {}]   ;;  %s6106_s4 = inlined_call_operand.vmem [shape: f32[3,32,96], index: 4, kind: input, shape index: {}]   ;;  %s6107_s5 = inlined_call_operand.vmem [shape: f32[3,32,32], index: 5, kind: input, shape index: {}]   ;;  %s6108_s6 = inlined_call_operand.vmem [shape: f32[3,1,32], index: 6, kind: input, shape index: {}]   ;;  %s6109_s7 = inlined_call_operand.vmem [shape: f32[3,32,128], index: 7, kind: input, shape index: {}]   ;;  %s6110_s8 = inlined_call_operand.vmem [shape: f32[3,64,32], index: 8, kind: input, shape index: {}]   ;;  %s6111_s9 = inlined_call_operand.vmem [shape: f32[1,32], index: 9, kind: input, shape index: {}]   ;;  %s6112_s10 = inlined_call_operand.vmem [shape: f32[32,32], index: 10, kind: input, shape index: {}]   ;;  %s6113_s11 = inlined_call_operand.vmem [shape: f32[1,32], index: 11, kind: input, shape index: {}]   ;;  %s6114_s12 = inlined_call_operand.vmem [shape: f32[32,128], index: 12, kind: input, shape index: {}]   ;;  %s6115_s13 = inlined_call_operand.vmem [shape: f32[1,128], index: 13, kind: input, shape index: {}]   ;;  %s6116_s14 = inlined_call_operand.hbm [shape: f32[2,1,128], index: 14, kind: output, shape index: {}]  }
   0x1   :  { %6148 = sst [smem:[#allocation12_spill]] %s6102_s0 }
   0x2   :  { %6149 = sst [smem:[#allocation13_spill]] %s6103_s1 }
   0x3   :  { %6150 = sst [smem:[#allocation14_spill]] %s6104_s2 }
   0x4   :  { %6151 = sst [smem:[#allocation15_spill]] %s6113_s11 }
   0x5   :  { %6152 = sst [smem:[#allocation16_spill]] %s6115_s13 }
   0x6   :  { %6153 = sst [smem:[#allocation17_spill]] %s6116_s14 }
   0x7   :  { %19 = vsyncpa [#allocation3], 0 }
   0x8   :  { %21 = vsyncpa [#allocation3 + $0x1], 0  ;;  %s5347_s29 = smov 0   ;;  %s5349_s30 = smov 0  }
   0x9   :  { %s5351_s15 = smov 0   ;;  %s5353_s16 = smov 0  }
   0xa LB: > { %6154 = sst [smem:[#allocation5_spill]] %s5244_s29  ;;  %s5368_s17 = sadd.s32 4294967295, %s5256_s16   ;;  %s5256_s16 = sphi %s5353_s16, %s6184_s16   ;;  %s5252_s15 = sphi %s5351_s15, %s6186_s15   ;;  %s5248_s30 = sphi %s5349_s30, %s6188_s30   ;;  %s5244_s29 = sphi %s5347_s29, %s6187_s29  }
   0xb   : > { %6155 = sst [smem:[#allocation6_spill]] %s5252_s15  ;;  %s4486_s18 = sadd.s32 4294967294, %s5256_s16  }
   0xc   : > { %6156 = sst [smem:[#allocation7_spill]] %s5256_s16  ;;  %s5372_s19 = sadd.s32 1, %s5256_s16  }
   0xd   : > { %6157 = sst [smem:[#allocation8_spill]] %s5372_s19  ;;  %s338_s20 = sadd.s32 1, %s5252_s15 }
   0xe   : > { %s335_s21 = ssub.s32 %s5256_s16, %s5372_s19  ;;  %p348_p0 = scmp.ne.s32.totalorder %s5252_s15, %s5248_s30 }
   0xf   : > { %p336_p1 = scmp.eq.s32.totalorder %s335_s21, 0  ;;  %p349_p2 = scmp.eq.s32.totalorder %s5368_s17, 1 }
  0x10   : > { %p354_p3 = scmp.ne.s32.totalorder %s5248_s30, %s5244_s29  ;;  %p355_p4 = scmp.eq.s32.totalorder %s4486_s18, 1 }
  0x11   : > { %s5383_s22 = scalar_select %p336_p1, %s5252_s15, %s338_s20  }
  0x12   : > { %p5385_p5 = por %p349_p2, %p348_p0  ;;  %p5389_p6 = por %p355_p4, %p354_p3 }
  0x13   : > { %6158 = sst [smem:[#allocation9_spill]] %s5383_s22  ;;  %p4489_p7 = scmp.ge.s32.totalorder %s5256_s16, 1 }
  0x14   : > { %s6159_s23 = scalar_select %p5385_p5, 1, 0 }
  0x15   : > { %s6161_s24 = scalar_select %p5389_p6, 1, 0 }
  0x16   : > { %6160 = sst [smem:[#allocation10_spill]] %s6159_s23  ;;  %p422_p8 = scmp.lt.s32.totalorder %s5256_s16, 3 }
  0x17   : > { %6162 = sst [smem:[#allocation11_spill]] %s6161_s24 }
  0x18   : > { %p423_p9 = pnand %p4489_p7, %p422_p8 }
  0x19   : > { %p469_p10 = scmp.lt.s32.totalorder (!%p423_p9), %s5368_s17, 1  ;;  %s6163_s0 = sld [smem:[#allocation12_spill]] (!%p423_p9) }
  0x1a   : > { %426 = sbr.rel (%p423_p9) target bundleno = 11070 (0x2b3e), region = 76  ;;  %s6136_s20 = smov (!%p423_p9), 96  }
  0x1b   : > { %s6118_s21 = smov (!%p423_p9), 120   ;;  %s6164_s1 = sld [smem:[#allocation13_spill]] (!%p423_p9) }
  0x1c   : > { %s6165_s2 = sld [smem:[#allocation14_spill]] (!%p423_p9)  ;;  %s6120_s22 = smov (!%p423_p9), 80  }
  0x1d   : > { %s6122_s28 = smov (!%p423_p9), 112   ;;  %s6126_s27 = smov (!%p423_p9), 104  }
  0x1e   : > { %s6176_s19 = smov (!%p423_p9), 40   ;;  %s467_s14 = sand.u32 (!%p423_p9), 1, %s5248_s30  }
  0x1f   : > { %s5397_s25 = scalar_select %p469_p10, %s5368_s17, 1  ;;  %vm480_vm0 = vcmask 261120   ;;  %v499_v3 = vld [vmem:[%s6106_s4 + $0x18] sm:$0xff]  ;;  %v5258_v4 = vmov 0.0   ;;  %v498_v5 = vld [vmem:[%s6106_s4 + $0x10] sm:$0xff]  ;;  %vm5259_vm1 = vmmov 0  }
  0x20   : > { %4746 = vmatprep.subr.mxu0 %v5258_v4  ;;  %4754 = vmatprep.mubr.msk.f32.mxu0 %vm5259_vm1, %v5258_v4  ;;  %v497_v6 = vld [vmem:[%s6106_s4 + $0x8] sm:$0xff]  ;;  %v496_v7 = vld [vmem:[%s6106_s4] sm:$0xff]  ;;  %vm581_vm2 = vcmask 64512   ;;  %vm1664_vm3 = vcmask 523264   ;;  %vm4233_vm4 = vcmask 253952  }
  0x21   : > { %s4490_s26 = sshll.u32 %s5397_s25, 3  ;;  %4747 = vmatpush3.msra.mxu0 %v499_v3  ;;  %4757 = vmatprep.subr.mxu1 %v5258_v4  ;;  %v4491_v12 = vld [vmem:[%s6105_s3] ss:$0 sm:$0xff]  ;;  %s5453_s15 = scalar_lea.vmem %s6164_s1, %s5397_s25  ;;  %v574_v49 = vld [vmem:[%s6107_s5 + $0x8] sm:$0xff] }
  0x22   : > { %s472_s18 = scalar_lea.vmem %s6163_s0, %s4490_s26  ;;  %4748 = vmatprep.subr.mxu0 %v5258_v4  ;;  %4759 = vmatprep.mubr.msk.f32.mxu1 %vm5259_vm1, %v5258_v4  ;;  %v577_v18 = vld [vmem:[%s6165_s2] sm:$0xff]  ;;  %s6134_s25 = smov 88   ;;  %v4497_v38 = vld [vmem:[%s6165_s2 + $0x8] sm:$0xff]  ;;  %v4503_v63 = vld [vmem:[%s6165_s2 + $0x10] sm:$0xff] }
  0x23   : > { %v5403_v0 = vld [vmem:[%s472_s18] sm:$0xff]  ;;  %4749 = vmatpush3.msra.mxu0 %v498_v5  ;;  %s6138_s18 = smov 64   ;;  %s6132_s26 = smov 56  }
  0x24   : > { %v479_v1 = vmul.f32 %v5403_v0, %v5403_v0  ;;  %4750 = vmatprep.subr.mxu0 %v5258_v4  ;;  %v5459_v19 = vld [vmem:[%s5453_s15] ss:$0 sm:$0xff]  ;;  %s6167_s0 = smov 96   ;;  %s6173_s1 = smov 48  }
  0x25   : > { %4751 = vmatpush3.msra.mxu0 %v497_v6  ;;  %v573_v54 = vld [vmem:[%s6107_s5] sm:$0xff] }
  0x26   : > { %v481_v2 = vsel %vm480_vm0, %v479_v1, 0.0  ;;  %4752 = vmatprep.subr.mxu0 %v5258_v4 }
  0x27   : > { %482 = vadd.xlane.f32.xlu0 %v481_v2  ;;  %4753 = vmatpush3.msra.mxu0 %v496_v7 }
  0x28   : > { %4777 = vmatprep.subr.mxu0 %v5258_v4 }
  0xb0   : > { %v483_v8 = vpop.xlane.xlu0 %482 }
  0xb1   : > { %v485_v9 = vmul.f32 0.03125, %v483_v8 }
  0xb3   : > { %v486_v10 = vadd.f32 1e-06, %v485_v9 }
  0xb5   : > { %5123 = vrsqrt.f32 %v486_v10 }
  0xc2   : > { %v5124_v11 = vpop.eup %5123 }
  0xc3   : > { %v488_v13 = vmul.f32 %v5124_v11, %v5403_v0 }
  0xc5   : > { %v495_v14 = vmul.f32 %v4491_v12, %v488_v13 }
  0xc7   : > { %4755 = vmatmul.mubr.msk.f32.vlgmr.msra.gmra.mxu0 %vm480_vm0, %v495_v14 }
  0xc8   : > { %4779 = vmatprep.mubr.msk.f32.mxu0 %vm5259_vm1, %v5258_v4  ;;  %4778 = vmatpush3.msra.mxu0 %v574_v49 }
  0xc9   : > { %4787 = vmatprep.subr.mxu0 %v5258_v4 }
 0x187   : > { %v5437_v15 = vpop.f32.mrf.mxu0 }
 0x188   : > { %579 = vrot.lane.b32.xlu0 %v5437_v15, %s6136_s20  ;;  %s6166_s20 = smov 64  }
 0x189   : > { %v4756_v16 = vpop.f32.mrf.mxu0 }
 0x18c   : > { %752 = vrot.lane.b32.xlu0 %v5437_v15, %s6118_s21  ;;  %s6124_s21 = smov 72  }
 0x1fa   : > { %v580_v17 = vpop.permute.xlu0 %579 }
 0x1fb   : > { %4758 = vmatpush3.xpose.msk.msra.mxu1 %vm581_vm2, %v580_v17 }
 0x1fc   : > { %4762 = vmatprep.subr.mxu1 %v5258_v4 }
 0x1fe   : > { %4760 = vmatmul.mubr.msk.f32.vlgmr.msra.gmra.mxu1 %vm581_vm2, %v5437_v15  ;;  %v753_v35 = vpop.permute.xlu0 %752 }
 0x1ff   : > { %4764 = vmatprep.mubr.msk.f32.mxu1 %vm5259_vm1, %v5258_v4 }
 0x2be   : > { %v652_v20 = vpop.f32.mrf.mxu1 }
 0x2bf   : > { %v653_v21 = vadd.f32 %v652_v20, %v577_v18  ;;  %v575_v20 = vld [vmem:[%s6107_s5 + $0x10] sm:$0xff] }
 0x2c0   : > { %v4761_v22 = vpop.f32.mrf.mxu1 }
 0x2c1   : > { %v662_v23 = vadd.f32 %v5459_v19, %v653_v21 }
 0x2c3   : > { %v663_v24 = vsel %vm581_vm2, %v662_v23, -inf }
 0x2c4   : > { %664 = vmax.xlane.f32.xlu1 %v663_v24 }
 0x2d5   : > { %674 = vrot.lane.b32.xlu1 %v5437_v15, %s6138_s18  ;;  %s6175_s18 = smov 72  }
 0x34d   : > { %v665_v25 = vpop.xlane.xlu1 %664 }
 0x34e   : > { %v666_v26 = vsub.f32 %v662_v23, %v665_v25  ;;  %v4508_v23 = vld [vmem:[%s6165_s2 + $0x18] sm:$0xff]  ;;  %s6174_s2 = smov 104  }
 0x350   : > { %v667_v27 = vmul.f32 1.442695, %v666_v26 }
 0x351   : > { %v675_v28 = vpop.permute.xlu1 %674 }
 0x352   : > { %5125 = vpow2.f32 %v667_v27  ;;  %4763 = vmatpush3.msra.mxu1 %v675_v28 }
 0x353   : > { %4767 = vmatprep.subr.mxu1 %v5258_v4 }
 0x35f   : > { %v5126_v29 = vpop.eup %5125 }
 0x360   : > { %v669_v30 = vsel %vm581_vm2, %v5126_v29, 0.0 }
 0x361   : > { %670 = vadd.xlane.f32.xlu1 %v669_v30 }
 0x372   : > { %754 = vrot.lane.b32.xlu1 %v5437_v15, %s6134_s25  ;;  %s6171_s25 = smov 112  }
 0x3ea   : > { %v671_v31 = vpop.xlane.xlu1 %670 }
 0x3eb   : > { %5127 = vrcp.f32 %v671_v31 }
 0x3ee   : > { %v755_v34 = vpop.permute.xlu1 %754 }
 0x3f8   : > { %v5128_v32 = vpop.eup %5127 }
 0x3f9   : > { %v673_v33 = vmul.f32 %v5128_v32, %v5126_v29 }
 0x3fb   : > { %4765 = vmatmul.mubr.msk.f32.vlgmr.msra.gmra.mxu1 %vm581_vm2, %v673_v33 }
 0x3fc   : > { %4768 = vmatpush3.xpose.msk.msra.mxu1 %vm581_vm2, %v755_v34  ;;  %4769 = vmatprep.mubr.msk.f32.mxu1 %vm5259_vm1, %v5258_v4 }
 0x3fd   : > { %4772 = vmatprep.subr.mxu1 %v5258_v4 }
 0x3ff   : > { %4770 = vmatmul.mubr.msk.f32.vlgmr.msra.gmra.mxu1 %vm581_vm2, %v753_v35 }
 0x400   : > { %4774 = vmatprep.mubr.msk.f32.mxu1 %vm5259_vm1, %v5258_v4 }
 0x4bb   : > { %v746_v36 = vpop.f32.mrf.mxu1 }
 0x4bd   : > { %v4766_v37 = vpop.f32.mrf.mxu1 }
 0x4bf   : > { %v826_v39 = vpop.f32.mrf.mxu1 }
 0x4c0   : > { %v827_v40 = vadd.f32 %v4497_v38, %v826_v39 }
 0x4c1   : > { %v4771_v41 = vpop.f32.mrf.mxu1 }
 0x4c2   : > { %v830_v42 = vadd.f32 %v5459_v19, %v827_v40 }
 0x4c4   : > { %v831_v43 = vsel %vm581_vm2, %v830_v42, -inf }
 0x4c5   : > { %832 = vmax.xlane.f32.xlu1 %v831_v43 }
 0x4d6   : > { %1068 = vrot.lane.b32.xlu1 %v5437_v15, %s6120_s22  ;;  %s6168_s22 = smov 88  }
 0x4da   : > { %1066 = vrot.lane.b32.xlu1 %v5437_v15, %s6122_s28  ;;  %s6128_s28 = smov 48  }
 0x54e   : > { %v833_v44 = vpop.xlane.xlu1 %832 }
 0x54f   : > { %v834_v45 = vsub.f32 %v830_v42, %v833_v44 }
 0x551   : > { %v835_v46 = vmul.f32 1.442695, %v834_v45 }
 0x552   : > { %v1069_v55 = vpop.permute.xlu1 %1068 }
 0x553   : > { %5129 = vpow2.f32 %v835_v46 }
 0x556   : > { %v1067_v58 = vpop.permute.xlu1 %1066 }
 0x560   : > { %v5130_v47 = vpop.eup %5129 }
 0x561   : > { %v837_v48 = vsel %vm581_vm2, %v5130_v47, 0.0 }
 0x562   : > { %838 = vadd.xlane.f32.xlu0 %v837_v48 }
 0x578   : > { %842 = vrot.lane.b32.xlu0 %v5437_v15, %s6132_s26  ;;  %s6172_s26 = smov 80  }
 0x5eb   : > { %v839_v50 = vpop.xlane.xlu0 %838 }
 0x5ec   : > { %5131 = vrcp.f32 %v839_v50  ;;  %v1568_v50 = vld [vmem:[%s6109_s7 + $0x18] sm:$0xff] }
 0x5ef   : > { %v843_v51 = vpop.permute.xlu0 %842 }
 0x5f0   : > { %4773 = vmatpush3.msra.mxu1 %v843_v51  ;;  %v1567_v51 = vld [vmem:[%s6109_s7 + $0x10] sm:$0xff] }
 0x5f1   : > { %4782 = vmatprep.subr.mxu1 %v5258_v4 }
 0x5f9   : > { %v5132_v52 = vpop.eup %5131 }
 0x5fa   : > { %v841_v53 = vmul.f32 %v5132_v52, %v5130_v47  ;;  %v1565_v52 = vld [vmem:[%s6109_s7] sm:$0xff] }
 0x5fc   : > { %4775 = vmatmul.mubr.msk.f32.vlgmr.msra.gmra.mxu1 %vm581_vm2, %v841_v53 }
 0x5fd   : > { %4783 = vmatpush3.msra.mxu1 %v573_v54  ;;  %4784 = vmatprep.mubr.msk.f32.mxu1 %vm5259_vm1, %v5258_v4 }
 0x5fe   : > { %4792 = vmatprep.subr.mxu1 %v5258_v4 }
 0x600   : > { %4785 = vmatmul.mubr.msk.f32.vlgmr.msra.gmra.mxu1 %vm581_vm2, %v746_v36  ;;  %v576_v36 = vld [vmem:[%s6107_s5 + $0x18] sm:$0xff] }
 0x601   : > { %4794 = vmatprep.mubr.msk.f32.mxu1 %vm5259_vm1, %v5258_v4 }
 0x6bc   : > { %v914_v56 = vpop.f32.mrf.mxu1 }
 0x6bd   : > { %4780 = vmatmul.mubr.msk.f32.vlgmr.msra.gmra.mxu0 %vm581_vm2, %v914_v56 }
 0x6be   : > { %4788 = vmatpush3.xpose.msk.msra.mxu0 %vm581_vm2, %v1069_v55  ;;  %v4776_v57 = vpop.f32.mrf.mxu1  ;;  %4789 = vmatprep.mubr.msk.f32.mxu0 %vm5259_vm1, %v5258_v4 }
 0x6bf   : > { %4797 = vmatprep.subr.mxu0 %v5258_v4  ;;  %v4513_v57 = vld [vmem:[%s6108_s6] ss:$0 sm:$0xff] }
 0x6c0   : > { %v5509_v59 = vpop.f32.mrf.mxu1 }
 0x6c1   : > { %4790 = vmatmul.mubr.msk.f32.vlgmr.msra.gmra.mxu0 %vm581_vm2, %v1067_v58 }
 0x6c2   : > { %v4786_v60 = vpop.f32.mrf.mxu1  ;;  %4799 = vmatprep.mubr.msk.f32.mxu0 %vm5259_vm1, %v5258_v4  ;;  %4798 = vmatpush3.msra.mxu0 %v575_v20 }
 0x6c3   : > { %4807 = vmatprep.subr.mxu0 %v5258_v4  ;;  %v1663_v60 = vld [vmem:[%s6110_s8 + $0x38] sm:$0xff] }
 0x77d   : > { %v987_v61 = vpop.f32.mrf.mxu0 }
 0x77e   : > { %v1061_v34 = vadd.f32 %v5509_v59, %v987_v61  ;;  %v1662_v61 = vld [vmem:[%s6110_s8 + $0x30] sm:$0xff] }
 0x77f   : > { %v4781_v62 = vpop.f32.mrf.mxu0 }
 0x780   : > { %v1661_v62 = vld [vmem:[%s6110_s8 + $0x28] sm:$0xff] }
 0x781   : > { %v1140_v1 = vpop.f32.mrf.mxu0 }
 0x782   : > { %v1141_v2 = vadd.f32 %v4503_v63, %v1140_v1  ;;  %v1660_v63 = vld [vmem:[%s6110_s8 + $0x20] sm:$0xff]  ;;  %v1659_v1 = vld [vmem:[%s6110_s8 + $0x18] sm:$0xff] }
 0x783   : > { %v4791_v3 = vpop.f32.mrf.mxu0 }
 0x784   : > { %v1144_v5 = vadd.f32 %v5459_v19, %v1141_v2  ;;  %v1658_v2 = vld [vmem:[%s6110_s8 + $0x10] sm:$0xff]  ;;  %v1657_v3 = vld [vmem:[%s6110_s8 + $0x8] sm:$0xff] }
 0x786   : > { %v1145_v6 = vsel %vm581_vm2, %v1144_v5, -inf }
 0x787   : > { %1146 = vmax.xlane.f32.xlu0 %v1145_v6 }
 0x79d   : > { %1156 = vrot.lane.b32.xlu0 %v5437_v15, %s6128_s28  ;;  %s6130_s28 = smov 40  }
 0x7a1   : > { %1308 = vrot.lane.b32.xlu0 %v5437_v15, %s6126_s27  ;;  %s6169_s27 = smov 120  }
 0x810   : > { %v1147_v7 = vpop.xlane.xlu0 %1146 }
 0x811   : > { %v1148_v8 = vsub.f32 %v1144_v5, %v1147_v7  ;;  %v1656_v5 = vld [vmem:[%s6110_s8] sm:$0xff] }
 0x813   : > { %v1149_v9 = vmul.f32 1.442695, %v1148_v8 }
 0x814   : > { %v1157_v10 = vpop.permute.xlu0 %1156 }
 0x815   : > { %5133 = vpow2.f32 %v1149_v9  ;;  %4793 = vmatpush3.msra.mxu1 %v1157_v10 }
 0x816   : > { %4802 = vmatprep.subr.mxu1 %v5258_v4 }
 0x818   : > { %v1309_v18 = vpop.permute.xlu0 %1308 }
 0x822   : > { %v5134_v11 = vpop.eup %5133 }
 0x823   : > { %v1151_v12 = vsel %vm581_vm2, %v5134_v11, 0.0 }
 0x824   : > { %1152 = vadd.xlane.f32.xlu1 %v1151_v12 }
 0x835   : > { %1310 = vrot.lane.b32.xlu1 %v5437_v15, %s6124_s21  ;;  %s6170_s21 = smov 56  }
 0x8ad   : > { %v1153_v13 = vpop.xlane.xlu1 %1152 }
 0x8ae   : > { %5135 = vrcp.f32 %v1153_v13 }
 0x8b1   : > { %v1311_v17 = vpop.permute.xlu1 %1310 }
 0x8bb   : > { %v5136_v14 = vpop.eup %5135 }
 0x8bc   : > { %v1155_v16 = vmul.f32 %v5136_v14, %v5134_v11 }
 0x8be   : > { %4795 = vmatmul.mubr.msk.f32.vlgmr.msra.gmra.mxu1 %vm581_vm2, %v1155_v16 }
 0x8bf   : > { %4803 = vmatpush3.xpose.msk.msra.mxu1 %vm581_vm2, %v1311_v17  ;;  %4804 = vmatprep.mubr.msk.f32.mxu1 %vm5259_vm1, %v5258_v4 }
 0x8c0   : > { %4812 = vmatprep.subr.mxu1 %v5258_v4 }
 0x8c2   : > { %4805 = vmatmul.mubr.msk.f32.vlgmr.msra.gmra.mxu1 %vm581_vm2, %v1309_v18 }
 0x8c3   : > { %4814 = vmatprep.mubr.msk.f32.mxu1 %vm5259_vm1, %v5258_v4  ;;  %4813 = vmatpush3.msra.mxu1 %v576_v36 }
 0x8c4   : > { %4828 = vmatprep.subr.mxu1 %v5258_v4 }
 0x97e   : > { %v1228_v21 = vpop.f32.mrf.mxu1 }
 0x97f   : > { %4800 = vmatmul.mubr.msk.f32.vlgmr.msra.gmra.mxu0 %vm581_vm2, %v1228_v21 }
 0x980   : > { %v4796_v22 = vpop.f32.mrf.mxu1  ;;  %4809 = vmatprep.mubr.msk.f32.mxu0 %vm5259_vm1, %v5258_v4 }
 0x982   : > { %v1382_v24 = vpop.f32.mrf.mxu1 }
 0x983   : > { %v1383_v25 = vadd.f32 %v4508_v23, %v1382_v24 }
 0x984   : > { %v4806_v26 = vpop.f32.mrf.mxu1 }
 0x985   : > { %v1386_v27 = vadd.f32 %v5459_v19, %v1383_v25  ;;  %v4521_v26 = vld [vmem:[%s6106_s4 + $0x38] sm:$0xff] }
 0x987   : > { %v1387_v28 = vsel %vm581_vm2, %v1386_v27, -inf }
 0x988   : > { %1388 = vmax.xlane.f32.xlu1 %v1387_v28  ;;  %v4519_v28 = vld [vmem:[%s6106_s4 + $0x28] sm:$0xff] }
 0xa11   : > { %v1389_v29 = vpop.xlane.xlu1 %1388 }
 0xa12   : > { %v1390_v30 = vsub.f32 %v1386_v27, %v1389_v29  ;;  %v4520_v27 = vld [vmem:[%s6106_s4 + $0x30] sm:$0xff]  ;;  %v4518_v29 = vld [vmem:[%s6106_s4 + $0x20] sm:$0xff] }
 0xa14   : > { %v1391_v31 = vmul.f32 1.442695, %v1390_v30 }
 0xa16   : > { %5137 = vpow2.f32 %v1391_v31 }
 0xa23   : > { %v5138_v32 = vpop.eup %5137 }
 0xa24   : > { %v1393_v33 = vsel %vm581_vm2, %v5138_v32, 0.0 }
 0xa25   : > { %1394 = vadd.xlane.f32.xlu0 %v1393_v33 }
 0xa3b   : > { %1398 = vrot.lane.b32.xlu0 %v5437_v15, %s6130_s28 }
 0xa3f   : > { %v1301_v35 = vpop.f32.mrf.mxu0 }
 0xa40   : > { %v1305_v37 = vadd.f32 %v1301_v35, %v1061_v34  ;;  %v4517_v34 = vld [vmem:[%s6105_s3 + $0x1] ss:$0 sm:$0xff] }
 0xa41   : > { %v4801_v38 = vpop.f32.mrf.mxu0 }
 0xaae   : > { %v1395_v39 = vpop.xlane.xlu0 %1394 }
 0xaaf   : > { %5139 = vrcp.f32 %v1395_v39 }
 0xab2   : > { %v1399_v40 = vpop.permute.xlu0 %1398 }
 0xab3   : > { %4808 = vmatpush3.msra.mxu0 %v1399_v40 }
 0xab4   : > { %4817 = vmatprep.subr.mxu0 %v5258_v4 }
 0xabc   : > { %v5140_v41 = vpop.eup %5139 }
 0xabd   : > { %v1397_v15 = vmul.f32 %v5140_v41, %v5138_v32 }
 0xabf   : > { %4810 = vmatmul.mubr.msk.f32.vlgmr.msra.gmra.mxu0 %vm581_vm2, %v1397_v15 }
 0xac0   : > { %4825 = vmatprep.mubr.msk.f32.mxu0 %vm5259_vm1, %v5258_v4  ;;  %4818 = vmatpush3.msra.mxu0 %v1568_v50 }
 0xac1   : > { %4819 = vmatprep.subr.mxu0 %v5258_v4 }
 0xac2   : > { %4820 = vmatpush3.msra.mxu0 %v1567_v51 }
 0xac3   : > { %4821 = vmatprep.subr.mxu0 %v5258_v4 }
 0xb7f   : > { %v1470_v42 = vpop.f32.mrf.mxu0 }
 0xb80   : > { %4815 = vmatmul.mubr.msk.f32.vlgmr.msra.gmra.mxu1 %vm581_vm2, %v1470_v42 }
 0xb81   : > { %v4811_v43 = vpop.f32.mrf.mxu0  ;;  %4844 = vmatprep.mubr.msk.f32.mxu1 %vm5259_vm1, %v5258_v4  ;;  %4829 = vmatpush3.msra.mxu1 %v1663_v60 }
 0xb82   : > { %4830 = vmatprep.subr.mxu1 %v5258_v4 }
 0xb83   : > { %4831 = vmatpush3.msra.mxu1 %v1662_v61 }
 0xb84   : > { %4832 = vmatprep.subr.mxu1 %v5258_v4 }
 0xb85   : > { %4833 = vmatpush3.msra.mxu1 %v1661_v62 }
 0xb86   : > { %4834 = vmatprep.subr.mxu1 %v5258_v4 }
 0xb87   : > { %4835 = vmatpush3.msra.mxu1 %v1660_v63 }
 0xb88   : > { %4836 = vmatprep.subr.mxu1 %v5258_v4 }
 0xb89   : > { %4837 = vmatpush3.msra.mxu1 %v1659_v1 }
 0xb8a   : > { %4838 = vmatprep.subr.mxu1 %v5258_v4 }
 0xb8b   : > { %4839 = vmatpush3.msra.mxu1 %v1658_v2 }
 0xb8c   : > { %4840 = vmatprep.subr.mxu1 %v5258_v4 }
 0xb8d   : > { %4841 = vmatpush3.msra.mxu1 %v1657_v3  ;;  %v4523_v3 = vld [vmem:[%s6107_s5 + $0x20] sm:$0xff] }
 0xb8e   : > { %4842 = vmatprep.subr.mxu1 %v5258_v4 }
 0xb8f   : > { %4843 = vmatpush3.msra.mxu1 %v1656_v5  ;;  %v4524_v5 = vld [vmem:[%s6107_s5 + $0x28] sm:$0xff] }
 0xb90   : > { %4863 = vmatprep.subr.mxu1 %v5258_v4 }
 0xc40   : > { %v1543_v44 = vpop.f32.mrf.mxu1 }
 0xc41   : > { %v1547_v45 = vadd.f32 %v1543_v44, %v1305_v37 }
 0xc42   : > { %v4816_v46 = vpop.f32.mrf.mxu1 }
 0xc43   : > { %v5563_v47 = vadd.f32 %v1547_v45, %v5403_v0  ;;  %v1566_v0 = vld [vmem:[%s6109_s7 + $0x8] sm:$0xff] }
 0xc44   : > { %4822 = vmatpush3.msra.mxu0 %v1566_v0 }
 0xc45   : > { %v1550_v48 = vmul.f32 %v5563_v47, %v5563_v47  ;;  %4823 = vmatprep.subr.mxu0 %v5258_v4 }
 0xc46   : > { %4824 = vmatpush3.msra.mxu0 %v1565_v52 }
 0xc47   : > { %v1551_v49 = vsel %vm480_vm0, %v1550_v48, 0.0  ;;  %4847 = vmatprep.subr.mxu0 %v5258_v4 }
 0xc48   : > { %1552 = vadd.xlane.f32.xlu1 %v1551_v49 }
 0xcd1   : > { %v1553_v53 = vpop.xlane.xlu1 %1552 }
 0xcd2   : > { %v1554_v54 = vmul.f32 0.03125, %v1553_v53 }
 0xcd4   : > { %v1555_v55 = vadd.f32 1e-06, %v1554_v54 }
 0xcd6   : > { %5141 = vrsqrt.f32 %v1555_v55 }
 0xce3   : > { %v5142_v56 = vpop.eup %5141 }
 0xce4   : > { %v1557_v58 = vmul.f32 %v5142_v56, %v5563_v47 }
 0xce6   : > { %v1564_v59 = vmul.f32 %v4513_v57, %v1557_v58 }
 0xce8   : > { %4826 = vmatmul.mubr.msk.f32.vlgmr.msra.gmra.mxu0 %vm480_vm0, %v1564_v59 }
 0xce9   : > { %4855 = vmatprep.mubr.msk.f32.mxu0 %vm5259_vm1, %v5258_v4  ;;  %4848 = vmatpush3.msra.mxu0 %v4521_v26 }
 0xcea   : > { %4849 = vmatprep.subr.mxu0 %v5258_v4 }
 0xceb   : > { %4850 = vmatpush3.msra.mxu0 %v4520_v27 }
 0xcec   : > { %4851 = vmatprep.subr.mxu0 %v5258_v4 }
 0xced   : > { %4852 = vmatpush3.msra.mxu0 %v4519_v28 }
 0xcee   : > { %4853 = vmatprep.subr.mxu0 %v5258_v4 }
 0xcef   : > { %4854 = vmatpush3.msra.mxu0 %v4518_v29 }
 0xcf0   : > { %4858 = vmatprep.subr.mxu0 %v5258_v4 }
 0xda8   : > { %v1638_v6 = vpop.f32.mrf.mxu0 }
 0xda9   : > { %1652 = vrot.lane.b32.xlu1 %v1638_v6, %s6166_s20  ;;  %v1643_v8 = vmul.f32 0.044715, %v1638_v6  ;;  %v1642_v16 = vmul.f32 0.5, %v1638_v6 }
 0xdaa   : > { %v4827_v7 = vpop.f32.mrf.mxu0 }
 0xdab   : > { %v1644_v9 = vmul.f32 %v1643_v8, %v1638_v6 }
 0xdad   : > { %v1645_v10 = vmul.f32 %v1644_v9, %v1638_v6 }
 0xdaf   : > { %v1646_v11 = vadd.f32 %v1645_v10, %v1638_v6 }
 0xdb1   : > { %v1647_v12 = vmul.f32 0.7978846, %v1646_v11 }
 0xdb3   : > { %5143 = vtanh.f32 %v1647_v12 }
 0xdc0   : > { %v5144_v13 = vpop.eup %5143 }
 0xdc1   : > { %v1649_v14 = vadd.f32 1.0, %v5144_v13 }
 0xdc3   : > { %v1650_v17 = vmul.f32 %v1649_v14, %v1642_v16 }
 0xe1b   : > { %v1653_v18 = vpop.permute.xlu1 %1652 }
 0xe1c   : > { %v1655_v20 = vmul.f32 %v1653_v18, %v1650_v17 }
 0xe1e   : > { %4845 = vmatmul.mubr.msk.f32.vlgmr.msra.gmra.mxu1 %vm1664_vm3, %v1655_v20 }
 0xe1f   : > { %4865 = vmatprep.mubr.msk.f32.mxu1 %vm5259_vm1, %v5258_v4 }
 0xede   : > { %v1734_v21 = vpop.f32.mrf.mxu1 }
 0xedf   : > { %v5628_v22 = vadd.f32 %v1734_v21, %v5563_v47 }
 0xee0   : > { %v4846_v23 = vpop.f32.mrf.mxu1 }
 0xee1   : > { %v1741_v24 = vmul.f32 %v5628_v22, %v5628_v22 }
 0xee3   : > { %v1742_v25 = vsel %vm480_vm0, %v1741_v24, 0.0 }
 0xee4   : > { %1743 = vadd.xlane.f32.xlu0 %v1742_v25 }
 0xf6d   : > { %v1744_v30 = vpop.xlane.xlu0 %1743 }
 0xf6e   : > { %v1745_v31 = vmul.f32 0.03125, %v1744_v30 }
 0xf70   : > { %v1746_v32 = vadd.f32 1e-06, %v1745_v31 }
 0xf72   : > { %5145 = vrsqrt.f32 %v1746_v32 }
 0xf7f   : > { %v5146_v33 = vpop.eup %5145 }
 0xf80   : > { %v1748_v35 = vmul.f32 %v5146_v33, %v5628_v22 }
 0xf82   : > { %v1755_v36 = vmul.f32 %v4517_v34, %v1748_v35  ;;  %v4525_v35 = vld [vmem:[%s6107_s5 + $0x30] sm:$0xff] }
 0xf84   : > { %4856 = vmatmul.mubr.msk.f32.vlgmr.msra.gmra.mxu0 %vm480_vm0, %v1755_v36 }
 0xf85   : > { %4860 = vmatprep.mubr.msk.f32.mxu0 %vm5259_vm1, %v5258_v4 }
0x1044   : > { %v5656_v37 = vpop.f32.mrf.mxu0 }
0x1045   : > { %1840 = vrot.lane.b32.xlu1 %v5656_v37, %s6167_s0 }
0x1046   : > { %v4857_v38 = vpop.f32.mrf.mxu0 }
0x1049   : > { %2005 = vrot.lane.b32.xlu1 %v5656_v37, %s6168_s22 }
0x104d   : > { %2003 = vrot.lane.b32.xlu1 %v5656_v37, %s6169_s27 }
0x10b7   : > { %v1841_v39 = vpop.permute.xlu1 %1840 }
0x10b8   : > { %4859 = vmatpush3.xpose.msk.msra.mxu0 %vm581_vm2, %v1841_v39 }
0x10b9   : > { %4868 = vmatprep.subr.mxu0 %v5258_v4 }
0x10bb   : > { %4861 = vmatmul.mubr.msk.f32.vlgmr.msra.gmra.mxu0 %vm581_vm2, %v5656_v37  ;;  %v2006_v40 = vpop.permute.xlu1 %2005 }
0x10bc   : > { %4869 = vmatpush3.xpose.msk.msra.mxu0 %vm581_vm2, %v2006_v40  ;;  %4870 = vmatprep.mubr.msk.f32.mxu0 %vm5259_vm1, %v5258_v4 }
0x10bd   : > { %4878 = vmatprep.subr.mxu0 %v5258_v4 }
0x10bf   : > { %v2004_v41 = vpop.permute.xlu1 %2003 }
0x10c0   : > { %4871 = vmatmul.mubr.msk.f32.vlgmr.msra.gmra.mxu0 %vm581_vm2, %v2004_v41 }
0x10c1   : > { %4880 = vmatprep.mubr.msk.f32.mxu0 %vm5259_vm1, %v5258_v4  ;;  %4879 = vmatpush3.msra.mxu0 %v4524_v5  ;;  %v4544_v5 = vld [vmem:[%s6108_s6 + $0x1] ss:$0 sm:$0xff] }
0x10c2   : > { %4888 = vmatprep.subr.mxu0 %v5258_v4 }
0x117b   : > { %v1912_v15 = vpop.f32.mrf.mxu0 }
0x117c   : > { %v1913_v42 = vadd.f32 %v5459_v19, %v1912_v15 }
0x117d   : > { %v4862_v43 = vpop.f32.mrf.mxu0 }
0x117e   : > { %v1916_v44 = vsel %vm581_vm2, %v1913_v42, -inf }
0x117f   : > { %1917 = vmax.xlane.f32.xlu1 %v1916_v44 }
0x1180   : > { %v2077_v45 = vpop.f32.mrf.mxu0 }
0x1181   : > { %v2078_v46 = vadd.f32 %v5459_v19, %v2077_v45 }
0x1182   : > { %v4872_v47 = vpop.f32.mrf.mxu0 }
0x1183   : > { %v2081_v48 = vsel %vm581_vm2, %v2078_v46, -inf  ;;  %v4526_v47 = vld [vmem:[%s6107_s5 + $0x38] sm:$0xff] }
0x1184   : > { %2082 = vmax.xlane.f32.xlu0 %v2081_v48 }
0x1190   : > { %2092 = vrot.lane.b32.xlu1 %v5656_v37, %s6170_s21 }
0x1194   : > { %2314 = vrot.lane.b32.xlu1 %v5656_v37, %s6171_s25 }
0x1208   : > { %v1918_v49 = vpop.xlane.xlu1 %1917 }
0x1209   : > { %v1919_v50 = vsub.f32 %v1913_v42, %v1918_v49 }
0x120b   : > { %v1920_v51 = vmul.f32 1.442695, %v1919_v50 }
0x120c   : > { %v2093_v63 = vpop.permute.xlu1 %2092 }
0x120d   : > { %5147 = vpow2.f32 %v1920_v51  ;;  %v2083_v0 = vpop.xlane.xlu0 %2082 }
0x120e   : > { %v2084_v52 = vsub.f32 %v2078_v46, %v2083_v0 }
0x1210   : > { %v2085_v53 = vmul.f32 1.442695, %v2084_v52  ;;  %v2315_v11 = vpop.permute.xlu1 %2314 }
0x1212   : > { %5149 = vpow2.f32 %v2085_v53 }
0x121a   : > { %v5148_v54 = vpop.eup %5147 }
0x121b   : > { %v1922_v55 = vsel %vm581_vm2, %v5148_v54, 0.0 }
0x121c   : > { %1923 = vadd.xlane.f32.xlu0 %v1922_v55 }
0x121f   : > { %v5150_v56 = vpop.eup %5149 }
0x1220   : > { %v2087_v57 = vsel %vm581_vm2, %v5150_v56, 0.0 }
0x1221   : > { %2088 = vadd.xlane.f32.xlu0 %v2087_v57 }
0x1237   : > { %1927 = vrot.lane.b32.xlu0 %v5656_v37, %s6166_s20 }
0x123b   : > { %2316 = vrot.lane.b32.xlu0 %v5656_v37, %s6172_s26 }
0x12a5   : > { %v1924_v58 = vpop.xlane.xlu0 %1923 }
0x12a6   : > { %5151 = vrcp.f32 %v1924_v58 }
0x12aa   : > { %v2089_v59 = vpop.xlane.xlu0 %2088 }
0x12ab   : > { %5153 = vrcp.f32 %v2089_v59 }
0x12ae   : > { %v1928_v60 = vpop.permute.xlu0 %1927 }
0x12af   : > { %4864 = vmatpush3.msra.mxu1 %v1928_v60  ;;  %v4548_v60 = vld [vmem:[%s6109_s7 + $0x38] sm:$0xff] }
0x12b0   : > { %4873 = vmatprep.subr.mxu1 %v5258_v4 }
0x12b2   : > { %v2317_v9 = vpop.permute.xlu0 %2316 }
0x12b3   : > { %v5152_v61 = vpop.eup %5151 }
0x12b4   : > { %v1926_v62 = vmul.f32 %v5152_v61, %v5148_v54  ;;  %v4547_v61 = vld [vmem:[%s6109_s7 + $0x30] sm:$0xff] }
0x12b6   : > { %4866 = vmatmul.mubr.msk.f32.vlgmr.msra.gmra.mxu1 %vm581_vm2, %v1926_v62  ;;  %v4545_v62 = vld [vmem:[%s6109_s7 + $0x20] sm:$0xff] }
0x12b7   : > { %4874 = vmatpush3.msra.mxu1 %v2093_v63  ;;  %4875 = vmatprep.mubr.msk.f32.mxu1 %vm5259_vm1, %v5258_v4 }
0x12b8   : > { %v5154_v1 = vpop.eup %5153  ;;  %4883 = vmatprep.subr.mxu1 %v5258_v4 }
0x12b9   : > { %v2091_v2 = vmul.f32 %v5154_v1, %v5150_v56 }
0x12bb   : > { %4876 = vmatmul.mubr.msk.f32.vlgmr.msra.gmra.mxu1 %vm581_vm2, %v2091_v2 }
0x12bc   : > { %4885 = vmatprep.mubr.msk.f32.mxu1 %vm5259_vm1, %v5258_v4  ;;  %4884 = vmatpush3.msra.mxu1 %v4523_v3 }
0x12bd   : > { %4893 = vmatprep.subr.mxu1 %v5258_v4 }
0x1376   : > { %v1999_v6 = vpop.f32.mrf.mxu1 }
0x1377   : > { %4886 = vmatmul.mubr.msk.f32.vlgmr.msra.gmra.mxu1 %vm581_vm2, %v1999_v6 }
0x1378   : > { %v4867_v7 = vpop.f32.mrf.mxu1  ;;  %4895 = vmatprep.mubr.msk.f32.mxu1 %vm5259_vm1, %v5258_v4 }
0x137b   : > { %v2164_v8 = vpop.f32.mrf.mxu1 }
0x137c   : > { %4881 = vmatmul.mubr.msk.f32.vlgmr.msra.gmra.mxu0 %vm581_vm2, %v2164_v8  ;;  %v4557_v8 = vld [vmem:[%s6110_s8 + $0x78] sm:$0xff] }
0x137d   : > { %4889 = vmatpush3.xpose.msk.msra.mxu0 %vm581_vm2, %v2317_v9  ;;  %v4877_v10 = vpop.f32.mrf.mxu1  ;;  %4890 = vmatprep.mubr.msk.f32.mxu0 %vm5259_vm1, %v5258_v4  ;;  %v4556_v9 = vld [vmem:[%s6110_s8 + $0x70] sm:$0xff] }
0x137e   : > { %4898 = vmatprep.subr.mxu0 %v5258_v4  ;;  %v4555_v10 = vld [vmem:[%s6110_s8 + $0x68] sm:$0xff] }
0x1380   : > { %4891 = vmatmul.mubr.msk.f32.vlgmr.msra.gmra.mxu0 %vm581_vm2, %v2315_v11  ;;  %v4554_v11 = vld [vmem:[%s6110_s8 + $0x60] sm:$0xff] }
0x1381   : > { %4900 = vmatprep.mubr.msk.f32.mxu0 %vm5259_vm1, %v5258_v4  ;;  %4899 = vmatpush3.msra.mxu0 %v4525_v35 }
0x1382   : > { %4908 = vmatprep.subr.mxu0 %v5258_v4 }
0x1437   : > { %v2310_v12 = vpop.f32.mrf.mxu1 }
0x1439   : > { %v4887_v13 = vpop.f32.mrf.mxu1 }
0x143a   : > { %v4552_v13 = vld [vmem:[%s6110_s8 + $0x50] sm:$0xff] }
0x143c   : > { %v2237_v14 = vpop.f32.mrf.mxu0 }
0x143d   : > { %v2311_v16 = vadd.f32 %v2310_v12, %v2237_v14  ;;  %v4553_v12 = vld [vmem:[%s6110_s8 + $0x58] sm:$0xff]  ;;  %v4551_v14 = vld [vmem:[%s6110_s8 + $0x48] sm:$0xff] }
0x143e   : > { %v4882_v17 = vpop.f32.mrf.mxu0 }
0x1440   : > { %v2388_v18 = vpop.f32.mrf.mxu0 }
0x1441   : > { %v2389_v20 = vadd.f32 %v5459_v19, %v2388_v18 }
0x1442   : > { %v4892_v21 = vpop.f32.mrf.mxu0 }
0x1443   : > { %v2392_v23 = vsel %vm581_vm2, %v2389_v20, -inf }
0x1444   : > { %2393 = vmax.xlane.f32.xlu0 %v2392_v23 }
0x145a   : > { %2403 = vrot.lane.b32.xlu0 %v5656_v37, %s6173_s1 }
0x145e   : > { %2553 = vrot.lane.b32.xlu0 %v5656_v37, %s6174_s2 }
0x14cd   : > { %v2394_v24 = vpop.xlane.xlu0 %2393 }
0x14ce   : > { %v2395_v25 = vsub.f32 %v2389_v20, %v2394_v24 }
0x14d0   : > { %v2396_v26 = vmul.f32 1.442695, %v2395_v25 }
0x14d1   : > { %v2404_v27 = vpop.permute.xlu0 %2403 }
0x14d2   : > { %5155 = vpow2.f32 %v2396_v26  ;;  %4894 = vmatpush3.msra.mxu1 %v2404_v27 }
0x14d3   : > { %4903 = vmatprep.subr.mxu1 %v5258_v4 }
0x14d5   : > { %v2554_v34 = vpop.permute.xlu0 %2553 }
0x14df   : > { %v5156_v28 = vpop.eup %5155 }
0x14e0   : > { %v2398_v29 = vsel %vm581_vm2, %v5156_v28, 0.0 }
0x14e1   : > { %2399 = vadd.xlane.f32.xlu1 %v2398_v29 }
0x14f2   : > { %2555 = vrot.lane.b32.xlu1 %v5656_v37, %s6175_s18 }
0x156a   : > { %v2400_v30 = vpop.xlane.xlu1 %2399 }
0x156b   : > { %5157 = vrcp.f32 %v2400_v30 }
0x156e   : > { %v2556_v33 = vpop.permute.xlu1 %2555 }
0x1578   : > { %v5158_v31 = vpop.eup %5157 }
0x1579   : > { %v2402_v32 = vmul.f32 %v5158_v31, %v5156_v28 }
0x157b   : > { %4896 = vmatmul.mubr.msk.f32.vlgmr.msra.gmra.mxu1 %vm581_vm2, %v2402_v32 }
0x157c   : > { %4904 = vmatpush3.xpose.msk.msra.mxu1 %vm581_vm2, %v2556_v33  ;;  %4905 = vmatprep.mubr.msk.f32.mxu1 %vm5259_vm1, %v5258_v4 }
0x157d   : > { %4913 = vmatprep.subr.mxu1 %v5258_v4 }
0x157f   : > { %4906 = vmatmul.mubr.msk.f32.vlgmr.msra.gmra.mxu1 %vm581_vm2, %v2554_v34 }
0x1580   : > { %4915 = vmatprep.mubr.msk.f32.mxu1 %vm5259_vm1, %v5258_v4  ;;  %4914 = vmatpush3.msra.mxu1 %v4526_v47 }
0x1581   : > { %4929 = vmatprep.subr.mxu1 %v5258_v4 }
0x163b   : > { %v2475_v36 = vpop.f32.mrf.mxu1 }
0x163c   : > { %4901 = vmatmul.mubr.msk.f32.vlgmr.msra.gmra.mxu0 %vm581_vm2, %v2475_v36 }
0x163d   : > { %v4897_v38 = vpop.f32.mrf.mxu1  ;;  %4910 = vmatprep.mubr.msk.f32.mxu0 %vm5259_vm1, %v5258_v4 }
0x163e   : > { %v4564_v38 = vld [vmem:[%s6106_s4 + $0x58] sm:$0xff] }
0x163f   : > { %v2627_v39 = vpop.f32.mrf.mxu1 }
0x1640   : > { %v2628_v40 = vadd.f32 %v5459_v19, %v2627_v39  ;;  %v4563_v39 = vld [vmem:[%s6106_s4 + $0x50] sm:$0xff] }
0x1641   : > { %v4907_v41 = vpop.f32.mrf.mxu1 }
0x1642   : > { %v2631_v15 = vsel %vm581_vm2, %v2628_v40, -inf  ;;  %v4561_v41 = vld [vmem:[%s6106_s4 + $0x40] sm:$0xff] }
0x1643   : > { %2632 = vmax.xlane.f32.xlu1 %v2631_v15 }
0x16cc   : > { %v2633_v42 = vpop.xlane.xlu1 %2632 }
0x16cd   : > { %v2634_v43 = vsub.f32 %v2628_v40, %v2633_v42  ;;  %v4562_v40 = vld [vmem:[%s6106_s4 + $0x48] sm:$0xff] }
0x16cf   : > { %v2635_v44 = vmul.f32 1.442695, %v2634_v43 }
0x16d1   : > { %5159 = vpow2.f32 %v2635_v44 }
0x16de   : > { %v5160_v45 = vpop.eup %5159 }
0x16df   : > { %v2637_v46 = vsel %vm581_vm2, %v5160_v45, 0.0 }
0x16e0   : > { %2638 = vadd.xlane.f32.xlu0 %v2637_v46 }
0x16f6   : > { %2642 = vrot.lane.b32.xlu0 %v5656_v37, %s6176_s19 }
0x16fc   : > { %v2548_v19 = vpop.f32.mrf.mxu0 }
0x16fd   : > { %v2552_v48 = vadd.f32 %v2548_v19, %v2311_v16  ;;  %v4550_v16 = vld [vmem:[%s6110_s8 + $0x40] sm:$0xff] }
0x16fe   : > { %v4902_v49 = vpop.f32.mrf.mxu0 }
0x1769   : > { %v2639_v50 = vpop.xlane.xlu0 %2638 }
0x176a   : > { %5161 = vrcp.f32 %v2639_v50 }
0x176d   : > { %v2643_v51 = vpop.permute.xlu0 %2642 }
0x176e   : > { %4909 = vmatpush3.msra.mxu0 %v2643_v51 }
0x176f   : > { %4918 = vmatprep.subr.mxu0 %v5258_v4 }
0x1777   : > { %v5162_v0 = vpop.eup %5161 }
0x1778   : > { %v2641_v52 = vmul.f32 %v5162_v0, %v5160_v45  ;;  %v4560_v45 = vld [vmem:[%s6105_s3 + $0x2] ss:$0 sm:$0xff] }
0x177a   : > { %4911 = vmatmul.mubr.msk.f32.vlgmr.msra.gmra.mxu0 %vm581_vm2, %v2641_v52  ;;  %v5871_v52 = vld [vmem:[%s5453_s15] ss:$0 sm:$0xff]  ;;  %s6179_s15 = sld [smem:[#allocation16_spill]] }
0x177b   : > { %4926 = vmatprep.mubr.msk.f32.mxu0 %vm5259_vm1, %v5258_v4  ;;  %4919 = vmatpush3.msra.mxu0 %v4548_v60 }
0x177c   : > { %4920 = vmatprep.subr.mxu0 %v5258_v4 }
0x177d   : > { %4921 = vmatpush3.msra.mxu0 %v4547_v61 }
0x177e   : > { %4922 = vmatprep.subr.mxu0 %v5258_v4 }
0x183a   : > { %v2714_v37 = vpop.f32.mrf.mxu0 }
0x183b   : > { %4916 = vmatmul.mubr.msk.f32.vlgmr.msra.gmra.mxu1 %vm581_vm2, %v2714_v37 }
0x183c   : > { %v4912_v53 = vpop.f32.mrf.mxu0  ;;  %4945 = vmatprep.mubr.msk.f32.mxu1 %vm5259_vm1, %v5258_v4  ;;  %4930 = vmatpush3.msra.mxu1 %v4557_v8 }
0x183d   : > { %4931 = vmatprep.subr.mxu1 %v5258_v4 }
0x183e   : > { %4932 = vmatpush3.msra.mxu1 %v4556_v9 }
0x183f   : > { %4933 = vmatprep.subr.mxu1 %v5258_v4 }
0x1840   : > { %4934 = vmatpush3.msra.mxu1 %v4555_v10 }
0x1841   : > { %4935 = vmatprep.subr.mxu1 %v5258_v4 }
0x1842   : > { %4936 = vmatpush3.msra.mxu1 %v4554_v11 }
0x1843   : > { %4937 = vmatprep.subr.mxu1 %v5258_v4 }
0x1844   : > { %4938 = vmatpush3.msra.mxu1 %v4553_v12 }
0x1845   : > { %4939 = vmatprep.subr.mxu1 %v5258_v4 }
0x1846   : > { %4940 = vmatpush3.msra.mxu1 %v4552_v13 }
0x1847   : > { %4941 = vmatprep.subr.mxu1 %v5258_v4 }
0x1848   : > { %4942 = vmatpush3.msra.mxu1 %v4551_v14  ;;  %v4566_v14 = vld [vmem:[%s6107_s5 + $0x40] sm:$0xff] }
0x1849   : > { %4943 = vmatprep.subr.mxu1 %v5258_v4 }
0x184a   : > { %4944 = vmatpush3.msra.mxu1 %v4550_v16  ;;  %v4567_v16 = vld [vmem:[%s6107_s5 + $0x48] sm:$0xff] }
0x184b   : > { %4964 = vmatprep.subr.mxu1 %v5258_v4 }
0x18fb   : > { %v2787_v54 = vpop.f32.mrf.mxu1 }
0x18fc   : > { %v2791_v55 = vadd.f32 %v2787_v54, %v2552_v48 }
0x18fd   : > { %v4917_v56 = vpop.f32.mrf.mxu1 }
0x18fe   : > { %v5758_v57 = vadd.f32 %v2791_v55, %v5628_v22  ;;  %v4546_v22 = vld [vmem:[%s6109_s7 + $0x28] sm:$0xff] }
0x18ff   : > { %4923 = vmatpush3.msra.mxu0 %v4546_v22 }
0x1900   : > { %v2795_v58 = vmul.f32 %v5758_v57, %v5758_v57  ;;  %4924 = vmatprep.subr.mxu0 %v5258_v4 }
0x1901   : > { %4925 = vmatpush3.msra.mxu0 %v4545_v62 }
0x1902   : > { %v2796_v59 = vsel %vm480_vm0, %v2795_v58, 0.0  ;;  %4948 = vmatprep.subr.mxu0 %v5258_v4 }
0x1903   : > { %2797 = vadd.xlane.f32.xlu1 %v2796_v59 }
0x198c   : > { %v2798_v63 = vpop.xlane.xlu1 %2797 }
0x198d   : > { %v2799_v1 = vmul.f32 0.03125, %v2798_v63 }
0x198f   : > { %v2800_v2 = vadd.f32 1e-06, %v2799_v1 }
0x1991   : > { %5163 = vrsqrt.f32 %v2800_v2 }
0x199e   : > { %v5164_v3 = vpop.eup %5163 }
0x199f   : > { %v2802_v6 = vmul.f32 %v5164_v3, %v5758_v57 }
0x19a1   : > { %v2809_v7 = vmul.f32 %v4544_v5, %v2802_v6 }
0x19a3   : > { %4927 = vmatmul.mubr.msk.f32.vlgmr.msra.gmra.mxu0 %vm480_vm0, %v2809_v7 }
0x19a4   : > { %4956 = vmatprep.mubr.msk.f32.mxu0 %vm5259_vm1, %v5258_v4  ;;  %4949 = vmatpush3.msra.mxu0 %v4564_v38 }
0x19a5   : > { %4950 = vmatprep.subr.mxu0 %v5258_v4 }
0x19a6   : > { %4951 = vmatpush3.msra.mxu0 %v4563_v39 }
0x19a7   : > { %4952 = vmatprep.subr.mxu0 %v5258_v4 }
0x19a8   : > { %4953 = vmatpush3.msra.mxu0 %v4562_v40 }
0x19a9   : > { %4954 = vmatprep.subr.mxu0 %v5258_v4 }
0x19aa   : > { %4955 = vmatpush3.msra.mxu0 %v4561_v41 }
0x19ab   : > { %4959 = vmatprep.subr.mxu0 %v5258_v4 }
0x1a63   : > { %v2884_v17 = vpop.f32.mrf.mxu0 }
0x1a64   : > { %2898 = vrot.lane.b32.xlu1 %v2884_v17, %s6166_s20  ;;  %v2889_v20 = vmul.f32 0.044715, %v2884_v17  ;;  %v2888_v28 = vmul.f32 0.5, %v2884_v17 }
0x1a65   : > { %v4928_v18 = vpop.f32.mrf.mxu0 }
0x1a66   : > { %v2890_v21 = vmul.f32 %v2889_v20, %v2884_v17 }
0x1a68   : > { %v2891_v23 = vmul.f32 %v2890_v21, %v2884_v17 }
0x1a6a   : > { %v2892_v24 = vadd.f32 %v2891_v23, %v2884_v17 }
0x1a6c   : > { %v2893_v25 = vmul.f32 0.7978846, %v2892_v24 }
0x1a6e   : > { %5165 = vtanh.f32 %v2893_v25 }
0x1a7b   : > { %v5166_v26 = vpop.eup %5165 }
0x1a7c   : > { %v2895_v27 = vadd.f32 1.0, %v5166_v26 }
0x1a7e   : > { %v2896_v29 = vmul.f32 %v2895_v27, %v2888_v28 }
0x1ad6   : > { %v2899_v30 = vpop.permute.xlu1 %2898 }
0x1ad7   : > { %v2901_v31 = vmul.f32 %v2899_v30, %v2896_v29 }
0x1ad9   : > { %4946 = vmatmul.mubr.msk.f32.vlgmr.msra.gmra.mxu1 %vm1664_vm3, %v2901_v31 }
0x1ada   : > { %4966 = vmatprep.mubr.msk.f32.mxu1 %vm5259_vm1, %v5258_v4 }
0x1b99   : > { %v2980_v32 = vpop.f32.mrf.mxu1 }
0x1b9a   : > { %v5823_v33 = vadd.f32 %v2980_v32, %v5758_v57 }
0x1b9b   : > { %v4947_v34 = vpop.f32.mrf.mxu1 }
0x1b9c   : > { %v2987_v35 = vmul.f32 %v5823_v33, %v5823_v33 }
0x1b9e   : > { %v2988_v36 = vsel %vm480_vm0, %v2987_v35, 0.0 }
0x1b9f   : > { %2989 = vadd.xlane.f32.xlu0 %v2988_v36 }
0x1c28   : > { %v2990_v15 = vpop.xlane.xlu0 %2989 }
0x1c29   : > { %v2991_v42 = vmul.f32 0.03125, %v2990_v15 }
0x1c2b   : > { %v2992_v43 = vadd.f32 1e-06, %v2991_v42 }
0x1c2d   : > { %5167 = vrsqrt.f32 %v2992_v43 }
0x1c3a   : > { %v5168_v44 = vpop.eup %5167 }
0x1c3b   : > { %v2994_v46 = vmul.f32 %v5168_v44, %v5823_v33 }
0x1c3d   : > { %v3001_v47 = vmul.f32 %v4560_v45, %v2994_v46  ;;  %v4568_v46 = vld [vmem:[%s6107_s5 + $0x50] sm:$0xff] }
0x1c3f   : > { %4957 = vmatmul.mubr.msk.f32.vlgmr.msra.gmra.mxu0 %vm480_vm0, %v3001_v47 }
0x1c40   : > { %4961 = vmatprep.mubr.msk.f32.mxu0 %vm5259_vm1, %v5258_v4 }
0x1cff   : > { %v5851_v19 = vpop.f32.mrf.mxu0 }
0x1d00   : > { %3086 = vrot.lane.b32.xlu1 %v5851_v19, %s6167_s0  ;;  %s4604_s0 = sshll.u32 %s5368_s17, 4 }
0x1d01   : > { %v4958_v48 = vpop.f32.mrf.mxu0 }
0x1d04   : > { %3251 = vrot.lane.b32.xlu1 %v5851_v19, %s6168_s22  ;;  %s468_s22 = scalar_lea.vmem [#allocation2], %s467_s14 }
0x1d08   : > { %3249 = vrot.lane.b32.xlu1 %v5851_v19, %s6169_s27  ;;  %s4422_s27 = sshll.u32 %s468_s22, 4  ;;  %s4423_s27 = int_to_ptr.vmem [resolvable:$true] %s4422_s27 }
0x1d72   : > { %v3087_v49 = vpop.permute.xlu1 %3086 }
0x1d73   : > { %4960 = vmatpush3.xpose.msk.msra.mxu0 %vm581_vm2, %v3087_v49 }
0x1d74   : > { %4969 = vmatprep.subr.mxu0 %v5258_v4 }
0x1d76   : > { %4962 = vmatmul.mubr.msk.f32.vlgmr.msra.gmra.mxu0 %vm581_vm2, %v5851_v19  ;;  %v3252_v50 = vpop.permute.xlu1 %3251 }
0x1d77   : > { %4970 = vmatpush3.xpose.msk.msra.mxu0 %vm581_vm2, %v3252_v50  ;;  %4971 = vmatprep.mubr.msk.f32.mxu0 %vm5259_vm1, %v5258_v4 }
0x1d78   : > { %4979 = vmatprep.subr.mxu0 %v5258_v4 }
0x1d7a   : > { %v3250_v51 = vpop.permute.xlu1 %3249 }
0x1d7b   : > { %4972 = vmatmul.mubr.msk.f32.vlgmr.msra.gmra.mxu0 %vm581_vm2, %v3250_v51 }
0x1d7c   : > { %4981 = vmatprep.mubr.msk.f32.mxu0 %vm5259_vm1, %v5258_v4  ;;  %4980 = vmatpush3.msra.mxu0 %v4567_v16  ;;  %v4587_v16 = vld [vmem:[%s6108_s6 + $0x2] ss:$0 sm:$0xff] }
0x1d7d   : > { %4989 = vmatprep.subr.mxu0 %v5258_v4 }
0x1e36   : > { %v3158_v0 = vpop.f32.mrf.mxu0 }
0x1e37   : > { %v3159_v37 = vadd.f32 %v5871_v52, %v3158_v0 }
0x1e38   : > { %v4963_v53 = vpop.f32.mrf.mxu0 }
0x1e39   : > { %v3162_v54 = vsel %vm581_vm2, %v3159_v37, -inf }
0x1e3a   : > { %3163 = vmax.xlane.f32.xlu1 %v3162_v54 }
0x1e3b   : > { %v3323_v55 = vpop.f32.mrf.mxu0 }
0x1e3c   : > { %v3324_v56 = vadd.f32 %v5871_v52, %v3323_v55 }
0x1e3d   : > { %v4973_v57 = vpop.f32.mrf.mxu0 }
0x1e3e   : > { %v3327_v58 = vsel %vm581_vm2, %v3324_v56, -inf  ;;  %v4569_v57 = vld [vmem:[%s6107_s5 + $0x58] sm:$0xff] }
0x1e3f   : > { %3328 = vmax.xlane.f32.xlu0 %v3327_v58 }
0x1e4b   : > { %3338 = vrot.lane.b32.xlu1 %v5851_v19, %s6170_s21 }
0x1e4f   : > { %3560 = vrot.lane.b32.xlu1 %v5851_v19, %s6171_s25 }
0x1ec3   : > { %v3164_v59 = vpop.xlane.xlu1 %3163 }
0x1ec4   : > { %v3165_v60 = vsub.f32 %v3159_v37, %v3164_v59 }
0x1ec6   : > { %v3166_v61 = vmul.f32 1.442695, %v3165_v60 }
0x1ec7   : > { %v3339_v11 = vpop.permute.xlu1 %3338 }
0x1ec8   : > { %5169 = vpow2.f32 %v3166_v61  ;;  %v3329_v22 = vpop.xlane.xlu0 %3328 }
0x1ec9   : > { %v3330_v62 = vsub.f32 %v3324_v56, %v3329_v22 }
0x1ecb   : > { %v3331_v63 = vmul.f32 1.442695, %v3330_v62  ;;  %v3561_v24 = vpop.permute.xlu1 %3560 }
0x1ecd   : > { %5171 = vpow2.f32 %v3331_v63 }
0x1ed5   : > { %v5170_v1 = vpop.eup %5169 }
0x1ed6   : > { %v3168_v2 = vsel %vm581_vm2, %v5170_v1, 0.0 }
0x1ed7   : > { %3169 = vadd.xlane.f32.xlu0 %v3168_v2 }
0x1eda   : > { %v5172_v3 = vpop.eup %5171 }
0x1edb   : > { %v3333_v5 = vsel %vm581_vm2, %v5172_v3, 0.0 }
0x1edc   : > { %3334 = vadd.xlane.f32.xlu0 %v3333_v5 }
0x1ef2   : > { %3173 = vrot.lane.b32.xlu0 %v5851_v19, %s6166_s20 }
0x1ef6   : > { %3562 = vrot.lane.b32.xlu0 %v5851_v19, %s6172_s26  ;;  %s6180_s26 = sld [smem:[#allocation17_spill]] }
0x1f60   : > { %v3170_v6 = vpop.xlane.xlu0 %3169 }
0x1f61   : > { %5173 = vrcp.f32 %v3170_v6 }
0x1f65   : > { %v3335_v7 = vpop.xlane.xlu0 %3334 }
0x1f66   : > { %5175 = vrcp.f32 %v3335_v7 }
0x1f69   : > { %v3174_v8 = vpop.permute.xlu0 %3173 }
0x1f6a   : > { %4965 = vmatpush3.msra.mxu1 %v3174_v8  ;;  %v4591_v8 = vld [vmem:[%s6109_s7 + $0x58] sm:$0xff] }
0x1f6b   : > { %4974 = vmatprep.subr.mxu1 %v5258_v4 }
0x1f6d   : > { %v3563_v21 = vpop.permute.xlu0 %3562 }
0x1f6e   : > { %v5174_v9 = vpop.eup %5173 }
0x1f6f   : > { %v3172_v10 = vmul.f32 %v5174_v9, %v5170_v1  ;;  %v4590_v9 = vld [vmem:[%s6109_s7 + $0x50] sm:$0xff] }
0x1f71   : > { %4967 = vmatmul.mubr.msk.f32.vlgmr.msra.gmra.mxu1 %vm581_vm2, %v3172_v10  ;;  %v4588_v10 = vld [vmem:[%s6109_s7 + $0x40] sm:$0xff] }
0x1f72   : > { %4975 = vmatpush3.msra.mxu1 %v3339_v11  ;;  %4976 = vmatprep.mubr.msk.f32.mxu1 %vm5259_vm1, %v5258_v4 }
0x1f73   : > { %v5176_v12 = vpop.eup %5175  ;;  %4984 = vmatprep.subr.mxu1 %v5258_v4 }
0x1f74   : > { %v3337_v13 = vmul.f32 %v5176_v12, %v5172_v3 }
0x1f76   : > { %4977 = vmatmul.mubr.msk.f32.vlgmr.msra.gmra.mxu1 %vm581_vm2, %v3337_v13 }
0x1f77   : > { %4986 = vmatprep.mubr.msk.f32.mxu1 %vm5259_vm1, %v5258_v4  ;;  %4985 = vmatpush3.msra.mxu1 %v4566_v14 }
0x1f78   : > { %4994 = vmatprep.subr.mxu1 %v5258_v4 }
0x2031   : > { %v3245_v17 = vpop.f32.mrf.mxu1 }
0x2032   : > { %4987 = vmatmul.mubr.msk.f32.vlgmr.msra.gmra.mxu1 %vm581_vm2, %v3245_v17 }
0x2033   : > { %v4968_v18 = vpop.f32.mrf.mxu1  ;;  %4996 = vmatprep.mubr.msk.f32.mxu1 %vm5259_vm1, %v5258_v4 }
0x2036   : > { %v3410_v20 = vpop.f32.mrf.mxu1 }
0x2037   : > { %4982 = vmatmul.mubr.msk.f32.vlgmr.msra.gmra.mxu0 %vm581_vm2, %v3410_v20  ;;  %v4600_v20 = vld [vmem:[%s6110_s8 + $0xb8] sm:$0xff] }
0x2038   : > { %4990 = vmatpush3.xpose.msk.msra.mxu0 %vm581_vm2, %v3563_v21  ;;  %v4978_v23 = vpop.f32.mrf.mxu1  ;;  %4991 = vmatprep.mubr.msk.f32.mxu0 %vm5259_vm1, %v5258_v4  ;;  %v4599_v21 = vld [vmem:[%s6110_s8 + $0xb0] sm:$0xff] }
0x2039   : > { %4999 = vmatprep.subr.mxu0 %v5258_v4  ;;  %v4598_v23 = vld [vmem:[%s6110_s8 + $0xa8] sm:$0xff] }
0x203b   : > { %4992 = vmatmul.mubr.msk.f32.vlgmr.msra.gmra.mxu0 %vm581_vm2, %v3561_v24  ;;  %v4597_v24 = vld [vmem:[%s6110_s8 + $0xa0] sm:$0xff] }
0x203c   : > { %5001 = vmatprep.mubr.msk.f32.mxu0 %vm5259_vm1, %v5258_v4  ;;  %5000 = vmatpush3.msra.mxu0 %v4568_v46 }
0x203d   : > { %5009 = vmatprep.subr.mxu0 %v5258_v4 }
0x20f2   : > { %v3556_v25 = vpop.f32.mrf.mxu1 }
0x20f4   : > { %v4988_v26 = vpop.f32.mrf.mxu1 }
0x20f5   : > { %v4595_v26 = vld [vmem:[%s6110_s8 + $0x90] sm:$0xff] }
0x20f7   : > { %v3483_v27 = vpop.f32.mrf.mxu0 }
0x20f8   : > { %v3557_v28 = vadd.f32 %v3556_v25, %v3483_v27  ;;  %v4596_v25 = vld [vmem:[%s6110_s8 + $0x98] sm:$0xff]  ;;  %v4594_v27 = vld [vmem:[%s6110_s8 + $0x88] sm:$0xff] }
0x20f9   : > { %v4983_v29 = vpop.f32.mrf.mxu0 }
0x20fb   : > { %v3634_v30 = vpop.f32.mrf.mxu0 }
0x20fc   : > { %v3635_v31 = vadd.f32 %v5871_v52, %v3634_v30 }
0x20fd   : > { %v4993_v32 = vpop.f32.mrf.mxu0 }
0x20fe   : > { %v3638_v34 = vsel %vm581_vm2, %v3635_v31, -inf }
0x20ff   : > { %3639 = vmax.xlane.f32.xlu0 %v3638_v34 }
0x2115   : > { %3649 = vrot.lane.b32.xlu0 %v5851_v19, %s6173_s1  ;;  %s6067_s1 = scalar_lea.hbm %s6180_s26, %s4604_s0 }
0x2119   : > { %3799 = vrot.lane.b32.xlu0 %v5851_v19, %s6174_s2  ;;  %s4410_s2 = scalar_lea.sflag [#allocation3], %s467_s14 }
0x2188   : > { %v3640_v35 = vpop.xlane.xlu0 %3639 }
0x2189   : > { %v3641_v36 = vsub.f32 %v3635_v31, %v3640_v35 }
0x218b   : > { %v3642_v38 = vmul.f32 1.442695, %v3641_v36 }
0x218c   : > { %v3650_v39 = vpop.permute.xlu0 %3649 }
0x218d   : > { %5177 = vpow2.f32 %v3642_v38  ;;  %4995 = vmatpush3.msra.mxu1 %v3650_v39 }
0x218e   : > { %5004 = vmatprep.subr.mxu1 %v5258_v4 }
0x2190   : > { %v3800_v45 = vpop.permute.xlu0 %3799 }
0x219a   : > { %v5178_v40 = vpop.eup %5177 }
0x219b   : > { %v3644_v41 = vsel %vm581_vm2, %v5178_v40, 0.0 }
0x219c   : > { %3645 = vadd.xlane.f32.xlu1 %v3644_v41 }
0x21ad   : > { %3801 = vrot.lane.b32.xlu1 %v5851_v19, %s6175_s18  ;;  %s5196_s18 = scalar_lea.vmem %s4423_s27, 16 }
0x21ae   : > { %p5197_p11 = scmp.ne.s32.totalorder %s4423_s27, %s5196_s18 }
0x21b0   : > { %p5198_p12 = pnand %p5197_p11, %p5385_p5 }
0x21b2   : > { %p5199_p13 = pneg %p5198_p12 }
0x2225   : > { %v3646_v15 = vpop.xlane.xlu1 %3645 }
0x2226   : > { %5179 = vrcp.f32 %v3646_v15 }
0x2229   : > { %v3802_v44 = vpop.permute.xlu1 %3801 }
0x2233   : > { %v5180_v42 = vpop.eup %5179 }
0x2234   : > { %v3648_v43 = vmul.f32 %v5180_v42, %v5178_v40 }
0x2236   : > { %4997 = vmatmul.mubr.msk.f32.vlgmr.msra.gmra.mxu1 %vm581_vm2, %v3648_v43 }
0x2237   : > { %5005 = vmatpush3.xpose.msk.msra.mxu1 %vm581_vm2, %v3802_v44  ;;  %5006 = vmatprep.mubr.msk.f32.mxu1 %vm5259_vm1, %v5258_v4 }
0x2238   : > { %5014 = vmatprep.subr.mxu1 %v5258_v4 }
0x223a   : > { %5007 = vmatmul.mubr.msk.f32.vlgmr.msra.gmra.mxu1 %vm581_vm2, %v3800_v45 }
0x223b   : > { %5016 = vmatprep.mubr.msk.f32.mxu1 %vm5259_vm1, %v5258_v4  ;;  %5015 = vmatpush3.msra.mxu1 %v4569_v57  ;;  %v4253_v57 = vld [vmem:[%s6112_s10 + $0x10] sm:$0xff] }
0x223c   : > { %5030 = vmatprep.subr.mxu1 %v5258_v4 }
0x22f6   : > { %v3721_v47 = vpop.f32.mrf.mxu1 }
0x22f7   : > { %5002 = vmatmul.mubr.msk.f32.vlgmr.msra.gmra.mxu0 %vm581_vm2, %v3721_v47 }
0x22f8   : > { %v4998_v48 = vpop.f32.mrf.mxu1  ;;  %5011 = vmatprep.mubr.msk.f32.mxu0 %vm5259_vm1, %v5258_v4 }
0x22fa   : > { %v3873_v49 = vpop.f32.mrf.mxu1 }
0x22fb   : > { %v3874_v50 = vadd.f32 %v5871_v52, %v3873_v49 }
0x22fc   : > { %v5008_v51 = vpop.f32.mrf.mxu1 }
0x22fd   : > { %v3877_v0 = vsel %vm581_vm2, %v3874_v50, -inf }
0x22fe   : > { %3878 = vmax.xlane.f32.xlu1 %v3877_v0  ;;  %v4231_v0 = vld [vmem:[%s6111_s9] sm:$0x1] }
0x2387   : > { %v3879_v37 = vpop.xlane.xlu1 %3878 }
0x2388   : > { %v3880_v53 = vsub.f32 %v3874_v50, %v3879_v37 }
0x238a   : > { %v3881_v54 = vmul.f32 1.442695, %v3880_v53 }
0x238c   : > { %5181 = vpow2.f32 %v3881_v54 }
0x2399   : > { %v5182_v55 = vpop.eup %5181 }
0x239a   : > { %v3883_v56 = vsel %vm581_vm2, %v5182_v55, 0.0 }
0x239b   : > { %3884 = vadd.xlane.f32.xlu0 %v3883_v56  ;;  %v4254_v56 = vld [vmem:[%s6112_s10 + $0x18] sm:$0xff] }
0x23b1   : > { %3888 = vrot.lane.b32.xlu0 %v5851_v19, %s6176_s19  ;;  %s5271_s19 = smov [#allocation2]  }
0x23b2   : > { %s5200_s17 = sshll.u32 %s5271_s19, 4  ;;  %s5201_s17 = int_to_ptr.vmem [resolvable:$false] %s5200_s17 }
0x23b3   : > { %s5202_s16 = scalar_lea.vmem %s5201_s17, 32  ;;  %p5203_p0 = scmp.lt.s32.totalorder %s4423_s27, %s5201_s17 }
0x23b4   : > { %p5204_p1 = scmp.lt.s32.totalorder %s5202_s16, %s5196_s18 }
0x23b6   : > { %p5205_p2 = por %p5204_p1, %p5203_p0 }
0x23b7   : > { %v3794_v52 = vpop.f32.mrf.mxu0 }
0x23b8   : > { %v3798_v58 = vadd.f32 %v3794_v52, %v3557_v28  ;;  %v4593_v28 = vld [vmem:[%s6110_s8 + $0x80] sm:$0xff]  ;;  %v4252_v52 = vld [vmem:[%s6112_s10 + $0x8] sm:$0xff]  ;;  %p5206_p3 = pnand %p5205_p2, %p5199_p13 }
0x23b9   : > { %v5003_v59 = vpop.f32.mrf.mxu0 }
0x2424   : > { %v3885_v60 = vpop.xlane.xlu0 %3884 }
0x2425   : > { %5183 = vrcp.f32 %v3885_v60 }
0x2428   : > { %v3889_v61 = vpop.permute.xlu0 %3888 }
0x2429   : > { %5010 = vmatpush3.msra.mxu0 %v3889_v61 }
0x242a   : > { %5019 = vmatprep.subr.mxu0 %v5258_v4 }
0x2432   : > { %v5184_v22 = vpop.eup %5183 }
0x2433   : > { %v3887_v62 = vmul.f32 %v5184_v22, %v5182_v55 }
0x2435   : > { %5012 = vmatmul.mubr.msk.f32.vlgmr.msra.gmra.mxu0 %vm581_vm2, %v3887_v62 }
0x2436   : > { %5027 = vmatprep.mubr.msk.f32.mxu0 %vm5259_vm1, %v5258_v4  ;;  %5020 = vmatpush3.msra.mxu0 %v4591_v8 }
0x2437   : > { %5021 = vmatprep.subr.mxu0 %v5258_v4 }
0x2438   : > { %5022 = vmatpush3.msra.mxu0 %v4590_v9 }
0x2439   : > { %5023 = vmatprep.subr.mxu0 %v5258_v4 }
0x24f5   : > { %v3960_v19 = vpop.f32.mrf.mxu0 }
0x24f6   : > { %5017 = vmatmul.mubr.msk.f32.vlgmr.msra.gmra.mxu1 %vm581_vm2, %v3960_v19 }
0x24f7   : > { %v5013_v63 = vpop.f32.mrf.mxu0  ;;  %5046 = vmatprep.mubr.msk.f32.mxu1 %vm5259_vm1, %v5258_v4  ;;  %5031 = vmatpush3.msra.mxu1 %v4600_v20 }
0x24f8   : > { %5032 = vmatprep.subr.mxu1 %v5258_v4  ;;  %v4333_v63 = vld [vmem:[%s6114_s12 + $0x18] sm:$0xff] }
0x24f9   : > { %5033 = vmatpush3.msra.mxu1 %v4599_v21 }
0x24fa   : > { %5034 = vmatprep.subr.mxu1 %v5258_v4 }
0x24fb   : > { %5035 = vmatpush3.msra.mxu1 %v4598_v23 }
0x24fc   : > { %5036 = vmatprep.subr.mxu1 %v5258_v4 }
0x24fd   : > { %5037 = vmatpush3.msra.mxu1 %v4597_v24 }
0x24fe   : > { %5038 = vmatprep.subr.mxu1 %v5258_v4 }
0x24ff   : > { %5039 = vmatpush3.msra.mxu1 %v4596_v25 }
0x2500   : > { %5040 = vmatprep.subr.mxu1 %v5258_v4 }
0x2501   : > { %5041 = vmatpush3.msra.mxu1 %v4595_v26 }
0x2502   : > { %5042 = vmatprep.subr.mxu1 %v5258_v4 }
0x2503   : > { %5043 = vmatpush3.msra.mxu1 %v4594_v27 }
0x2504   : > { %5044 = vmatprep.subr.mxu1 %v5258_v4 }
0x2505   : > { %5045 = vmatpush3.msra.mxu1 %v4593_v28 }
0x25b6   : > { %v4033_v1 = vpop.f32.mrf.mxu1 }
0x25b7   : > { %v4037_v2 = vadd.f32 %v4033_v1, %v3798_v58  ;;  %v4251_v58 = vld [vmem:[%s6112_s10] sm:$0xff]  ;;  %v4332_v1 = vld [vmem:[%s6114_s12 + $0x10] sm:$0xff] }
0x25b8   : > { %v5018_v3 = vpop.f32.mrf.mxu1 }
0x25b9   : > { %v5956_v5 = vadd.f32 %v4037_v2, %v5823_v33  ;;  %v4589_v33 = vld [vmem:[%s6109_s7 + $0x48] sm:$0xff]  ;;  %v4330_v3 = vld [vmem:[%s6114_s12] sm:$0xff] }
0x25ba   : > { %5024 = vmatpush3.msra.mxu0 %v4589_v33  ;;  %v4331_v2 = vld [vmem:[%s6114_s12 + $0x8] sm:$0xff]  ;;  %v4334_v33 = vld [vmem:[%s6179_s15] sm:$0x1] }
0x25bb   : > { %v4041_v6 = vmul.f32 %v5956_v5, %v5956_v5  ;;  %5025 = vmatprep.subr.mxu0 %v5258_v4 }
0x25bc   : > { %5026 = vmatpush3.msra.mxu0 %v4588_v10 }
0x25bd   : > { %v4042_v7 = vsel %vm480_vm0, %v4041_v6, 0.0  ;;  %5049 = vmatprep.subr.mxu0 %v5258_v4 }
0x25be   : > { %4043 = vadd.xlane.f32.xlu1 %v4042_v7 }
0x2647   : > { %v4044_v11 = vpop.xlane.xlu1 %4043 }
0x2648   : > { %v4045_v12 = vmul.f32 0.03125, %v4044_v11 }
0x264a   : > { %v4046_v13 = vadd.f32 1e-06, %v4045_v12 }
0x264c   : > { %5185 = vrsqrt.f32 %v4046_v13 }
0x2659   : > { %v5186_v14 = vpop.eup %5185 }
0x265a   : > { %v4048_v17 = vmul.f32 %v5186_v14, %v5956_v5 }
0x265c   : > { %v4055_v18 = vmul.f32 %v4587_v16, %v4048_v17 }
0x265e   : > { %5028 = vmatmul.mubr.msk.f32.vlgmr.msra.gmra.mxu0 %vm480_vm0, %v4055_v18 }
0x265f   : > { %5057 = vmatprep.mubr.msk.f32.mxu0 %vm5259_vm1, %v5258_v4  ;;  %5050 = vmatpush3.msra.mxu0 %v4254_v56 }
0x2660   : > { %5051 = vmatprep.subr.mxu0 %v5258_v4 }
0x2661   : > { %5052 = vmatpush3.msra.mxu0 %v4253_v57 }
0x2662   : > { %5053 = vmatprep.subr.mxu0 %v5258_v4 }
0x2663   : > { %5054 = vmatpush3.msra.mxu0 %v4252_v52 }
0x2664   : > { %5055 = vmatprep.subr.mxu0 %v5258_v4 }
0x2665   : > { %5056 = vmatpush3.msra.mxu0 %v4251_v58 }
0x2666   : > { %5060 = vmatprep.subr.mxu0 %v5258_v4 }
0x271e   : > { %v4130_v29 = vpop.f32.mrf.mxu0 }
0x271f   : > { %4144 = vrot.lane.b32.xlu1 %v4130_v29, %s6166_s20  ;;  %v4135_v31 = vmul.f32 0.044715, %v4130_v29  ;;  %v4134_v40 = vmul.f32 0.5, %v4130_v29  ;;  %s6177_s20 = sld [smem:[#allocation15_spill]] }
0x2720   : > { %v5029_v30 = vpop.f32.mrf.mxu0 }
0x2721   : > { %v4136_v32 = vmul.f32 %v4135_v31, %v4130_v29 }
0x2723   : > { %v4137_v34 = vmul.f32 %v4136_v32, %v4130_v29 }
0x2725   : > { %v4138_v35 = vadd.f32 %v4137_v34, %v4130_v29 }
0x2727   : > { %v4139_v36 = vmul.f32 0.7978846, %v4138_v35 }
0x2729   : > { %5187 = vtanh.f32 %v4139_v36 }
0x2736   : > { %v5188_v38 = vpop.eup %5187 }
0x2737   : > { %v4141_v39 = vadd.f32 1.0, %v5188_v38 }
0x2739   : > { %v4142_v41 = vmul.f32 %v4141_v39, %v4134_v40 }
0x2791   : > { %v4145_v15 = vpop.permute.xlu1 %4144 }
0x2792   : > { %v4147_v42 = vmul.f32 %v4145_v15, %v4142_v41 }
0x2794   : > { %5047 = vmatmul.mubr.msk.f32.vlgmr.msra.gmra.mxu1 %vm1664_vm3, %v4147_v42 }
0x2854   : > { %v4226_v43 = vpop.f32.mrf.mxu1 }
0x2855   : > { %v4230_v44 = vadd.f32 %v4226_v43, %v5956_v5  ;;  %v4255_v5 = vld [vmem:[%s6177_s20] sm:$0x1] }
0x2856   : > { %v5048_v45 = vpop.f32.mrf.mxu1 }
0x2857   : > { %v4232_v46 = vmul.f32 %v4230_v44, %v4230_v44 }
0x2859   : > { %v4234_v47 = vsel %vm4233_vm4, %v4232_v46, 0.0 }
0x285a   : > { %4235 = vadd.xlane.f32.xlu0 %v4234_v47 }
0x28e3   : > { %v4236_v48 = vpop.xlane.xlu0 %4235 }
0x28e4   : > { %v4237_v49 = vmul.f32 0.03125, %v4236_v48 }
0x28e6   : > { %v4238_v50 = vadd.f32 1e-06, %v4237_v49 }
0x28e8   : > { %5189 = vrsqrt.f32 %v4238_v50 }
0x28f5   : > { %v5190_v51 = vpop.eup %5189 }
0x28f6   : > { %v4240_v37 = vmul.f32 %v5190_v51, %v4230_v44 }
0x28f8   : > { %v4241_v53 = vmul.f32 %v4240_v37, %v4231_v0 }
0x28fa   : > { %v4242_v54 = vmul.f32 %v4241_v53, %v4241_v53 }
0x28fc   : > { %v4243_v55 = vsel %vm4233_vm4, %v4242_v54, 0.0 }
0x28fd   : > { %4244 = vadd.xlane.f32.xlu1 %v4243_v55 }
0x2986   : > { %v4245_v59 = vpop.xlane.xlu1 %4244 }
0x2987   : > { %v4246_v60 = vmul.f32 0.03125, %v4245_v59 }
0x2989   : > { %v4247_v61 = vadd.f32 1e-06, %v4246_v60 }
0x298b   : > { %5191 = vrsqrt.f32 %v4247_v61 }
0x2998   : > { %v5192_v22 = vpop.eup %5191 }
0x2999   : > { %v4249_v62 = vmul.f32 %v5192_v22, %v4241_v53 }
0x299b   : > { %v4250_v19 = vmul.f32 %v4249_v62, %v4231_v0 }
0x299d   : > { %5058 = vmatmul.mubr.msk.f32.vlgmr.msra.gmra.mxu0 %vm480_vm0, %v4250_v19 }
0x299e   : > { %5068 = vmatprep.mubr.msk.f32.mxu0 %vm5259_vm1, %v5258_v4  ;;  %5061 = vmatpush3.msra.mxu0 %v4333_v63 }
0x299f   : > { %5062 = vmatprep.subr.mxu0 %v5258_v4 }
0x29a0   : > { %5063 = vmatpush3.msra.mxu0 %v4332_v1 }
0x29a1   : > { %5064 = vmatprep.subr.mxu0 %v5258_v4 }
0x29a2   : > { %5065 = vmatpush3.msra.mxu0 %v4331_v2 }
0x29a3   : > { %5066 = vmatprep.subr.mxu0 %v5258_v4 }
0x29a4   : > { %5067 = vmatpush3.msra.mxu0 %v4330_v3 }
0x2a5d   : > { %v4325_v6 = vpop.f32.mrf.mxu0 }
0x2a5e   : > { %v4326_v7 = vadd.f32 %v4325_v6, %v4255_v5 }
0x2a5f   : > { %v5059_v8 = vpop.f32.mrf.mxu0 }
0x2a60   : > { %5193 = vtanh.f32 %v4326_v7 }
0x2a6d   : > { %v5194_v9 = vpop.eup %5193 }
0x2a6e   : > { %5069 = vmatmul.mubr.msk.f32.vlgmr.msra.gmra.mxu0 %vm480_vm0, %v5194_v9 }
0x2b2e   : > { %v4404_v4 = vpop.f32.mrf.mxu0 }
0x2b2f   : > { %v4405_v10 = vadd.f32 %v4404_v4, %v4334_v33 }
0x2b30   : > { %v5070_v11 = vpop.f32.mrf.mxu0 }
0x2b31   : > { %4408 = vst [vmem:[%s468_s22] sm:$0x1] %v4405_v10 }
0x2b32   : > { %5209 = shalt.err (!%p5206_p3)
}
0x2b33   : > { %s5210_s23 = scalar_lea.hbm %s6067_s1, 16  ;;  %s5214_s20 = scalar_lea.hbm %s6180_s26, 32 }
0x2b34   : > { %p5211_p4 = scmp.ne.s32.totalorder %s6067_s1, %s5210_s23  ;;  %p5215_p9 = scmp.lt.s32.totalorder %s6067_s1, %s6180_s26 }
0x2b35   : > { %p5216_p10 = scmp.lt.s32.totalorder %s5214_s20, %s5210_s23 }
0x2b36   : > { %p5212_p7 = pnand %p5211_p4, %p5385_p5 }
0x2b37   : > { %p5217_p11 = por %p5216_p10, %p5215_p9 }
0x2b38   : > { %p5213_p8 = pneg %p5212_p7 }
0x2b3a   : > { %p5218_p12 = pnand %p5217_p11, %p5213_p8 }
0x2b3c   : > { %5221 = shalt.err (!%p5218_p12)
}
0x2b3d   : > { %5071 = dma.vmem_to_hbm [thread:$0]  (%p5385_p5), %s4423_s27, 16, %s6067_s1, %s4410_s2  }
0x2b3e PF: > { %s6181_s29 = sld [smem:[#allocation7_spill]] }
0x2b3f   : > { %s6182_s15 = sld [smem:[#allocation5_spill]] }
0x2b44   : > { %p5077_p13 = scmp.ge.s32.totalorder %s6181_s29, 2 }
0x2b45   : > { %s4434_s22 = sand.u32 1, %s6182_s15  }
0x2b46   : > { %p5074_p0 = pnand %p5077_p13, %p5389_p6  ;;  %s4435_s21 = scalar_lea.sflag [#allocation3], %s4434_s22 }
0x2b48   : > { %p5075_p1 = pneg %p5074_p0 }
0x2b4a   : > { %5239 = dma.done.wait (%p5075_p1), %s4435_s21, 16  }
0x2b4b   : > { %5241 = vsyncadd (%p5075_p1), %s4435_s21, 4294967280  ;;  %s6184_s16 = sld [smem:[#allocation8_spill]]  ;;  %s6187_s29 = smov %s5248_s30 }
0x2b4c   : > { %s6185_s25 = sld [smem:[#allocation6_spill]] }
0x2b4d   : > { %s6186_s15 = sld [smem:[#allocation9_spill]] }
0x2b51   : > { %p24_p2 = scmp.ge.s32.totalorder %s6184_s16, 4  }
0x2b52   : > { %s6188_s30 = smov %s6185_s25 }
0x2b53   :  { %26 = sbr.rel (!%p24_p2) target bundleno = 10 (0xa), region = 129 }
0x2b58   :  { %4439 = vsyncpa [#allocation3], 1 }
0x2b59   :  { %4441 = vsyncpa [#allocation3 + $0x1], 1 }

</bundles_post_ra>
